<compile_context>
chip_gen: v7x
topology: tpu7x:2x2x1
jax: 0.10.0
libtpu: 0.0.40
codegen_flags: <defaults>
</compile_context>

<pallas_src>
import functools

import jax
import jax.numpy as jnp
from jax.experimental import pallas as pl
from jax.experimental.pallas import tpu as pltpu


def _round_up(x, m):
    return ((x + m - 1) // m) * m


def _sae_fwd_kernel(
    x_ref,
    ew1, eb1, ew2, eb2, ew3, eb3, ew4, eb4,
    dw1, db1, dw2, db2, dw3, db3, dw4, db4,
    xhat_ref,
):
    def leaky(v):  # F.leaky_relu default negative_slope = 0.01
        return jnp.where(v > 0, v, 0.01 * v)

    def dot(a, w_ref):
        # bf16 x bf16 -> f32 accumulation on the MXU.
        return jnp.dot(a.astype(jnp.bfloat16), w_ref[...],
                       preferred_element_type=jnp.float32)

    # ----- encoder
    h = x_ref[...]                                   # (block_m, n_features) bf16
    h = leaky(dot(h, ew1) + eb1[...])                # (block_m, 256) f32
    h = leaky(dot(h, ew2) + eb2[...])                # (block_m, 128)
    h = leaky(dot(h, ew3) + eb3[...])                # (block_m, 64)
    z = dot(h, ew4) + eb4[...]                       # (block_m, z_dim), no activation

    # ----- decoder
    d = leaky(dot(z, dw1) + db1[...])                # (block_m, 64)
    d = leaky(dot(d, dw2) + db2[...])                # (block_m, 128)
    d = leaky(dot(d, dw3) + db3[...])                # (block_m, 256)
    xhat_ref[...] = dot(d, dw4) + db4[...]           # (block_m, n_out_pad), no activation


def george_sae_forward(x, params, *, block_m=512):
    """x: (B, n_features) float32. params: flat list of (in,out) weights / (1,out) biases."""
    (ew1, eb1, ew2, eb2, ew3, eb3, ew4, eb4,
     dw1, db1, dw2, db2, dw3, db3, dw4, db4) = params
    B, n_features = x.shape

    # Lane-dense output: pad the final Linear's out-features to a multiple of
    # 128 (zero columns) so x_hat stores are unmasked; slice padding off below.
    n_out_pad = _round_up(n_features, 128)
    pad_cols = n_out_pad - n_features
    dw4p = jnp.pad(dw4, ((0, 0), (0, pad_cols)))
    db4p = jnp.pad(db4, ((0, 0), (0, pad_cols)))

    # Batch tiling: block_m rows per grid step (multiple of 128 keeps the MXU
    # LHS aligned on v5e's 128-wide / v6e-v7x's 256-wide geometry).
    bm = min(block_m, _round_up(B, 128))
    b_pad = _round_up(B, bm)
    xp = x.astype(jnp.bfloat16)
    if b_pad != B:
        xp = jnp.pad(xp, ((0, b_pad - B), (0, 0)))

    # Cast weights to bf16 once in the wrapper (halves VMEM + DMA bytes);
    # biases stay f32 and are added after the f32-accumulated matmul.
    wc = lambda w: w.astype(jnp.bfloat16)
    operands = [
        wc(ew1), eb1, wc(ew2), eb2, wc(ew3), eb3, wc(ew4), eb4,
        wc(dw1), db1, wc(dw2), db2, wc(dw3), db3, wc(dw4p), db4p,
    ]

    x_map = lambda i: (i, 0)          # batch-tiled
    const_map = lambda i: (0, 0)      # VMEM-resident across all grid steps
    full_spec = lambda arr: pl.BlockSpec(arr.shape, const_map)

    xhat_pad = pl.pallas_call(
        _sae_fwd_kernel,
        out_shape=jax.ShapeDtypeStruct((b_pad, n_out_pad), jnp.float32),
        grid_spec=pltpu.PrefetchScalarGridSpec(
            num_scalar_prefetch=0,
            grid=(b_pad // bm,),
            in_specs=[pl.BlockSpec((bm, n_features), x_map)]
                     + [full_spec(a) for a in operands],
            out_specs=pl.BlockSpec((bm, n_out_pad), x_map),
        ),
        compiler_params=pltpu.CompilerParams(
            dimension_semantics=("parallel",),      # megacore sharding on v7x
            vmem_limit_bytes=32 * 1024 * 1024,      # safe on v5e/v6e/v7x
        ),
    )(xp, *operands)

    return xhat_pad[:B, :n_features]


# ---------------------------------------------------------------------------
# Deterministic parameter construction (PyTorch-default-style init, f32).
# Weights are stored pre-transposed to (in, out); biases as (1, out).
# ---------------------------------------------------------------------------
def _linear_params(key, fan_in, fan_out):
    kw, kb = jax.random.split(key)
    bound = 1.0 / jnp.sqrt(fan_in)
    w = jax.random.uniform(kw, (fan_in, fan_out), jnp.float32, -bound, bound)
    b = jax.random.uniform(kb, (1, fan_out), jnp.float32, -bound, bound)
    return w, b


def make_params(key, n_features, z_dim):
    keys = jax.random.split(key, 8)
    ew1, eb1 = _linear_params(keys[0], n_features, 256)
    ew2, eb2 = _linear_params(keys[1], 256, 128)
    ew3, eb3 = _linear_params(keys[2], 128, 64)
    ew4, eb4 = _linear_params(keys[3], 64, z_dim)
    dw1, db1 = _linear_params(keys[4], z_dim, 64)
    dw2, db2 = _linear_params(keys[5], 64, 128)
    dw3, db3 = _linear_params(keys[6], 128, 256)
    dw4, db4 = _linear_params(keys[7], 256, n_features)
    return [ew1, eb1, ew2, eb2, ew3, eb3, ew4, eb4,
            dw1, db1, dw2, db2, dw3, db3, dw4, db4]


def _reference_forward(x, params):
    """Plain-JAX reference mirroring the kernel's bf16-matmul / f32-acc numerics."""
    (ew1, eb1, ew2, eb2, ew3, eb3, ew4, eb4,
     dw1, db1, dw2, db2, dw3, db3, dw4, db4) = params
    leaky = lambda v: jnp.where(v > 0, v, 0.01 * v)
    bf = jnp.bfloat16
    dot = lambda a, w: jnp.dot(a.astype(bf), w.astype(bf),
                               preferred_element_type=jnp.float32)
    h = leaky(dot(x, ew1) + eb1)
    h = leaky(dot(h, ew2) + eb2)
    h = leaky(dot(h, ew3) + eb3)
    z = dot(h, ew4) + eb4
    d = leaky(dot(z, dw1) + db1)
    d = leaky(dot(d, dw2) + db2)
    d = leaky(dot(d, dw3) + db3)
    return dot(d, dw4) + db4


if __name__ == "__main__":
    B = 200            # not a multiple of block_m -> exercises tail padding
    n_features = 32
    z_dim = 8

    key = jax.random.PRNGKey(0)
    k_x, k_p = jax.random.split(key)
    x = jax.random.normal(k_x, (B, n_features), dtype=jnp.float32)
    params = make_params(k_p, n_features, z_dim)

    fwd = jax.jit(functools.partial(george_sae_forward, block_m=128))
    x_hat = fwd(x, params)
    jax.block_until_ready(x_hat)

    ref = _reference_forward(x, params)
    assert x_hat.shape == (B, n_features)
    assert jnp.allclose(x_hat, ref, atol=1e-2, rtol=1e-2)

    print("KERNEL_OK")
</pallas_src>

<mosaic_0001>
module attributes {stable_mosaic.version = 11 : i64} {
  func.func @_sae_fwd_kernel(%arg0: i32, %arg1: memref<128x32xbf16, #tpu.memory_space<vmem>>, %arg2: memref<32x256xbf16, #tpu.memory_space<vmem>>, %arg3: memref<1x256xf32, #tpu.memory_space<vmem>>, %arg4: memref<256x128xbf16, #tpu.memory_space<vmem>>, %arg5: memref<1x128xf32, #tpu.memory_space<vmem>>, %arg6: memref<128x64xbf16, #tpu.memory_space<vmem>>, %arg7: memref<1x64xf32, #tpu.memory_space<vmem>>, %arg8: memref<64x8xbf16, #tpu.memory_space<vmem>>, %arg9: memref<1x8xf32, #tpu.memory_space<vmem>>, %arg10: memref<8x64xbf16, #tpu.memory_space<vmem>>, %arg11: memref<1x64xf32, #tpu.memory_space<vmem>>, %arg12: memref<64x128xbf16, #tpu.memory_space<vmem>>, %arg13: memref<1x128xf32, #tpu.memory_space<vmem>>, %arg14: memref<128x256xbf16, #tpu.memory_space<vmem>>, %arg15: memref<1x256xf32, #tpu.memory_space<vmem>>, %arg16: memref<256x128xbf16, #tpu.memory_space<vmem>>, %arg17: memref<1x128xf32, #tpu.memory_space<vmem>>, %arg18: memref<128x128xf32, #tpu.memory_space<vmem>>) attributes {dimension_semantics = [#tpu.dimension_semantics<parallel>], iteration_bounds = array<i64: 2>, scalar_prefetch = 0 : i64, scratch_operands = 0 : i64, tpu.core_type = #tpu.core_type<tc>, window_params = [{transform_indices = @transform_0, window_bounds = array<i64: 128, 32>}, {pipeline_mode = #tpu.pipeline_mode<synchronous>, transform_indices = @transform_1, window_bounds = array<i64: 32, 256>}, {pipeline_mode = #tpu.pipeline_mode<synchronous>, transform_indices = @transform_2, window_bounds = array<i64: 1, 256>}, {pipeline_mode = #tpu.pipeline_mode<synchronous>, transform_indices = @transform_3, window_bounds = array<i64: 256, 128>}, {pipeline_mode = #tpu.pipeline_mode<synchronous>, transform_indices = @transform_4, window_bounds = array<i64: 1, 128>}, {pipeline_mode = #tpu.pipeline_mode<synchronous>, transform_indices = @transform_5, window_bounds = array<i64: 128, 64>}, {pipeline_mode = #tpu.pipeline_mode<synchronous>, transform_indices = @transform_6, window_bounds = array<i64: 1, 64>}, {pipeline_mode = #tpu.pipeline_mode<synchronous>, transform_indices = @transform_7, window_bounds = array<i64: 64, 8>}, {pipeline_mode = #tpu.pipeline_mode<synchronous>, transform_indices = @transform_8, window_bounds = array<i64: 1, 8>}, {pipeline_mode = #tpu.pipeline_mode<synchronous>, transform_indices = @transform_9, window_bounds = array<i64: 8, 64>}, {pipeline_mode = #tpu.pipeline_mode<synchronous>, transform_indices = @transform_10, window_bounds = array<i64: 1, 64>}, {pipeline_mode = #tpu.pipeline_mode<synchronous>, transform_indices = @transform_11, window_bounds = array<i64: 64, 128>}, {pipeline_mode = #tpu.pipeline_mode<synchronous>, transform_indices = @transform_12, window_bounds = array<i64: 1, 128>}, {pipeline_mode = #tpu.pipeline_mode<synchronous>, transform_indices = @transform_13, window_bounds = array<i64: 128, 256>}, {pipeline_mode = #tpu.pipeline_mode<synchronous>, transform_indices = @transform_14, window_bounds = array<i64: 1, 256>}, {pipeline_mode = #tpu.pipeline_mode<synchronous>, transform_indices = @transform_15, window_bounds = array<i64: 256, 128>}, {pipeline_mode = #tpu.pipeline_mode<synchronous>, transform_indices = @transform_16, window_bounds = array<i64: 1, 128>}, {transform_indices = @transform_17, window_bounds = array<i64: 128, 128>}]} {
    %c0 = arith.constant 0 : index
    %c0_0 = arith.constant 0 : index
    %0 = vector.load %arg1[%c0, %c0_0] : memref<128x32xbf16, #tpu.memory_space<vmem>>, vector<128x32xbf16>
    %c0_1 = arith.constant 0 : index
    %c0_2 = arith.constant 0 : index
    %1 = vector.load %arg2[%c0_1, %c0_2] : memref<32x256xbf16, #tpu.memory_space<vmem>>, vector<32x256xbf16>
    %cst = arith.constant dense<0.000000e+00> : vector<128x256xf32>
    %2 = tpu.matmul %0, %1, %cst {dimension_numbers = #tpu.dot_dimension_numbers<[1], [0], [0], [1], [0, 0, 1, 1], [], []>} : vector<128x32xbf16>, vector<32x256xbf16>, vector<128x256xf32> -> vector<128x256xf32>
    %c0_3 = arith.constant 0 : index
    %c0_4 = arith.constant 0 : index
    %3 = vector.load %arg3[%c0_3, %c0_4] : memref<1x256xf32, #tpu.memory_space<vmem>>, vector<1x256xf32>
    %4 = vector.broadcast %3 : vector<1x256xf32> to vector<128x256xf32>
    %5 = arith.addf %2, %4 : vector<128x256xf32>
    %cst_5 = arith.constant 0.000000e+00 : f32
    %6 = vector.broadcast %cst_5 : f32 to vector<128x256xf32>
    %7 = arith.cmpf ogt, %5, %6 : vector<128x256xf32>
    %cst_6 = arith.constant 0.00999999977 : f32
    %8 = vector.broadcast %cst_6 : f32 to vector<128x256xf32>
    %9 = arith.mulf %8, %5 : vector<128x256xf32>
    %10 = arith.select %7, %5, %9 : vector<128x256xi1>, vector<128x256xf32>
    %11 = arith.truncf %10 : vector<128x256xf32> to vector<128x256xbf16>
    %c0_7 = arith.constant 0 : index
    %c0_8 = arith.constant 0 : index
    %12 = vector.load %arg4[%c0_7, %c0_8] : memref<256x128xbf16, #tpu.memory_space<vmem>>, vector<256x128xbf16>
    %cst_9 = arith.constant dense<0.000000e+00> : vector<128x128xf32>
    %13 = tpu.matmul %11, %12, %cst_9 {dimension_numbers = #tpu.dot_dimension_numbers<[1], [0], [0], [1], [0, 0, 1, 1], [], []>} : vector<128x256xbf16>, vector<256x128xbf16>, vector<128x128xf32> -> vector<128x128xf32>
    %c0_10 = arith.constant 0 : index
    %c0_11 = arith.constant 0 : index
    %14 = vector.load %arg5[%c0_10, %c0_11] : memref<1x128xf32, #tpu.memory_space<vmem>>, vector<1x128xf32>
    %15 = vector.broadcast %14 : vector<1x128xf32> to vector<128x128xf32>
    %16 = arith.addf %13, %15 : vector<128x128xf32>
    %cst_12 = arith.constant 0.000000e+00 : f32
    %17 = vector.broadcast %cst_12 : f32 to vector<128x128xf32>
    %18 = arith.cmpf ogt, %16, %17 : vector<128x128xf32>
    %cst_13 = arith.constant 0.00999999977 : f32
    %19 = vector.broadcast %cst_13 : f32 to vector<128x128xf32>
    %20 = arith.mulf %19, %16 : vector<128x128xf32>
    %21 = arith.select %18, %16, %20 : vector<128x128xi1>, vector<128x128xf32>
    %22 = arith.truncf %21 : vector<128x128xf32> to vector<128x128xbf16>
    %c0_14 = arith.constant 0 : index
    %c0_15 = arith.constant 0 : index
    %23 = vector.load %arg6[%c0_14, %c0_15] : memref<128x64xbf16, #tpu.memory_space<vmem>>, vector<128x64xbf16>
    %cst_16 = arith.constant dense<0.000000e+00> : vector<128x64xf32>
    %24 = tpu.matmul %22, %23, %cst_16 {dimension_numbers = #tpu.dot_dimension_numbers<[1], [0], [0], [1], [0, 0, 1, 1], [], []>} : vector<128x128xbf16>, vector<128x64xbf16>, vector<128x64xf32> -> vector<128x64xf32>
    %c0_17 = arith.constant 0 : index
    %c0_18 = arith.constant 0 : index
    %25 = vector.load %arg7[%c0_17, %c0_18] : memref<1x64xf32, #tpu.memory_space<vmem>>, vector<1x64xf32>
    %26 = vector.broadcast %25 : vector<1x64xf32> to vector<128x64xf32>
    %27 = arith.addf %24, %26 : vector<128x64xf32>
    %cst_19 = arith.constant 0.000000e+00 : f32
    %28 = vector.broadcast %cst_19 : f32 to vector<128x64xf32>
    %29 = arith.cmpf ogt, %27, %28 : vector<128x64xf32>
    %cst_20 = arith.constant 0.00999999977 : f32
    %30 = vector.broadcast %cst_20 : f32 to vector<128x64xf32>
    %31 = arith.mulf %30, %27 : vector<128x64xf32>
    %32 = arith.select %29, %27, %31 : vector<128x64xi1>, vector<128x64xf32>
    %33 = arith.truncf %32 : vector<128x64xf32> to vector<128x64xbf16>
    %c0_21 = arith.constant 0 : index
    %c0_22 = arith.constant 0 : index
    %34 = vector.load %arg8[%c0_21, %c0_22] : memref<64x8xbf16, #tpu.memory_space<vmem>>, vector<64x8xbf16>
    %cst_23 = arith.constant dense<0.000000e+00> : vector<128x8xf32>
    %35 = tpu.matmul %33, %34, %cst_23 {dimension_numbers = #tpu.dot_dimension_numbers<[1], [0], [0], [1], [0, 0, 1, 1], [], []>} : vector<128x64xbf16>, vector<64x8xbf16>, vector<128x8xf32> -> vector<128x8xf32>
    %c0_24 = arith.constant 0 : index
    %c0_25 = arith.constant 0 : index
    %36 = vector.load %arg9[%c0_24, %c0_25] : memref<1x8xf32, #tpu.memory_space<vmem>>, vector<1x8xf32>
    %37 = vector.broadcast %36 : vector<1x8xf32> to vector<128x8xf32>
    %38 = arith.addf %35, %37 : vector<128x8xf32>
    %39 = arith.truncf %38 : vector<128x8xf32> to vector<128x8xbf16>
    %c0_26 = arith.constant 0 : index
    %c0_27 = arith.constant 0 : index
    %40 = vector.load %arg10[%c0_26, %c0_27] : memref<8x64xbf16, #tpu.memory_space<vmem>>, vector<8x64xbf16>
    %cst_28 = arith.constant dense<0.000000e+00> : vector<128x64xf32>
    %41 = tpu.matmul %39, %40, %cst_28 {dimension_numbers = #tpu.dot_dimension_numbers<[1], [0], [0], [1], [0, 0, 1, 1], [], []>} : vector<128x8xbf16>, vector<8x64xbf16>, vector<128x64xf32> -> vector<128x64xf32>
    %c0_29 = arith.constant 0 : index
    %c0_30 = arith.constant 0 : index
    %42 = vector.load %arg11[%c0_29, %c0_30] : memref<1x64xf32, #tpu.memory_space<vmem>>, vector<1x64xf32>
    %43 = vector.broadcast %42 : vector<1x64xf32> to vector<128x64xf32>
    %44 = arith.addf %41, %43 : vector<128x64xf32>
    %cst_31 = arith.constant 0.000000e+00 : f32
    %45 = vector.broadcast %cst_31 : f32 to vector<128x64xf32>
    %46 = arith.cmpf ogt, %44, %45 : vector<128x64xf32>
    %cst_32 = arith.constant 0.00999999977 : f32
    %47 = vector.broadcast %cst_32 : f32 to vector<128x64xf32>
    %48 = arith.mulf %47, %44 : vector<128x64xf32>
    %49 = arith.select %46, %44, %48 : vector<128x64xi1>, vector<128x64xf32>
    %50 = arith.truncf %49 : vector<128x64xf32> to vector<128x64xbf16>
    %c0_33 = arith.constant 0 : index
    %c0_34 = arith.constant 0 : index
    %51 = vector.load %arg12[%c0_33, %c0_34] : memref<64x128xbf16, #tpu.memory_space<vmem>>, vector<64x128xbf16>
    %cst_35 = arith.constant dense<0.000000e+00> : vector<128x128xf32>
    %52 = tpu.matmul %50, %51, %cst_35 {dimension_numbers = #tpu.dot_dimension_numbers<[1], [0], [0], [1], [0, 0, 1, 1], [], []>} : vector<128x64xbf16>, vector<64x128xbf16>, vector<128x128xf32> -> vector<128x128xf32>
    %c0_36 = arith.constant 0 : index
    %c0_37 = arith.constant 0 : index
    %53 = vector.load %arg13[%c0_36, %c0_37] : memref<1x128xf32, #tpu.memory_space<vmem>>, vector<1x128xf32>
    %54 = vector.broadcast %53 : vector<1x128xf32> to vector<128x128xf32>
    %55 = arith.addf %52, %54 : vector<128x128xf32>
    %cst_38 = arith.constant 0.000000e+00 : f32
    %56 = vector.broadcast %cst_38 : f32 to vector<128x128xf32>
    %57 = arith.cmpf ogt, %55, %56 : vector<128x128xf32>
    %cst_39 = arith.constant 0.00999999977 : f32
    %58 = vector.broadcast %cst_39 : f32 to vector<128x128xf32>
    %59 = arith.mulf %58, %55 : vector<128x128xf32>
    %60 = arith.select %57, %55, %59 : vector<128x128xi1>, vector<128x128xf32>
    %61 = arith.truncf %60 : vector<128x128xf32> to vector<128x128xbf16>
    %c0_40 = arith.constant 0 : index
    %c0_41 = arith.constant 0 : index
    %62 = vector.load %arg14[%c0_40, %c0_41] : memref<128x256xbf16, #tpu.memory_space<vmem>>, vector<128x256xbf16>
    %cst_42 = arith.constant dense<0.000000e+00> : vector<128x256xf32>
    %63 = tpu.matmul %61, %62, %cst_42 {dimension_numbers = #tpu.dot_dimension_numbers<[1], [0], [0], [1], [0, 0, 1, 1], [], []>} : vector<128x128xbf16>, vector<128x256xbf16>, vector<128x256xf32> -> vector<128x256xf32>
    %c0_43 = arith.constant 0 : index
    %c0_44 = arith.constant 0 : index
    %64 = vector.load %arg15[%c0_43, %c0_44] : memref<1x256xf32, #tpu.memory_space<vmem>>, vector<1x256xf32>
    %65 = vector.broadcast %64 : vector<1x256xf32> to vector<128x256xf32>
    %66 = arith.addf %63, %65 : vector<128x256xf32>
    %cst_45 = arith.constant 0.000000e+00 : f32
    %67 = vector.broadcast %cst_45 : f32 to vector<128x256xf32>
    %68 = arith.cmpf ogt, %66, %67 : vector<128x256xf32>
    %cst_46 = arith.constant 0.00999999977 : f32
    %69 = vector.broadcast %cst_46 : f32 to vector<128x256xf32>
    %70 = arith.mulf %69, %66 : vector<128x256xf32>
    %71 = arith.select %68, %66, %70 : vector<128x256xi1>, vector<128x256xf32>
    %72 = arith.truncf %71 : vector<128x256xf32> to vector<128x256xbf16>
    %c0_47 = arith.constant 0 : index
    %c0_48 = arith.constant 0 : index
    %73 = vector.load %arg16[%c0_47, %c0_48] : memref<256x128xbf16, #tpu.memory_space<vmem>>, vector<256x128xbf16>
    %cst_49 = arith.constant dense<0.000000e+00> : vector<128x128xf32>
    %74 = tpu.matmul %72, %73, %cst_49 {dimension_numbers = #tpu.dot_dimension_numbers<[1], [0], [0], [1], [0, 0, 1, 1], [], []>} : vector<128x256xbf16>, vector<256x128xbf16>, vector<128x128xf32> -> vector<128x128xf32>
    %c0_50 = arith.constant 0 : index
    %c0_51 = arith.constant 0 : index
    %75 = vector.load %arg17[%c0_50, %c0_51] : memref<1x128xf32, #tpu.memory_space<vmem>>, vector<1x128xf32>
    %76 = vector.broadcast %75 : vector<1x128xf32> to vector<128x128xf32>
    %77 = arith.addf %74, %76 : vector<128x128xf32>
    %c0_52 = arith.constant 0 : index
    %c0_53 = arith.constant 0 : index
    %78 = vector.load %arg18[%c0_52, %c0_53] : memref<128x128xf32, #tpu.memory_space<vmem>>, vector<128x128xf32>
    tpu.vector_store %arg18[%c0_52, %c0_53], %77 {strides = array<i32>} : memref<128x128xf32, #tpu.memory_space<vmem>>, vector<128x128xf32>,
    return
  }
  func.func @transform_0(%arg0: i32) -> (i32, i32) {
    %c0_i32 = arith.constant 0 : i32
    %c0_i32_0 = arith.constant 0 : i32
    return %arg0, %c0_i32 : i32, i32
  }
  func.func @transform_1(%arg0: i32) -> (i32, i32) {
    %c0_i32 = arith.constant 0 : i32
    %c0_i32_0 = arith.constant 0 : i32
    %c0_i32_1 = arith.constant 0 : i32
    return %c0_i32, %c0_i32_0 : i32, i32
  }
  func.func @transform_2(%arg0: i32) -> (i32, i32) {
    %c0_i32 = arith.constant 0 : i32
    %c0_i32_0 = arith.constant 0 : i32
    %c0_i32_1 = arith.constant 0 : i32
    return %c0_i32, %c0_i32_0 : i32, i32
  }
  func.func @transform_3(%arg0: i32) -> (i32, i32) {
    %c0_i32 = arith.constant 0 : i32
    %c0_i32_0 = arith.constant 0 : i32
    %c0_i32_1 = arith.constant 0 : i32
    return %c0_i32, %c0_i32_0 : i32, i32
  }
  func.func @transform_4(%arg0: i32) -> (i32, i32) {
    %c0_i32 = arith.constant 0 : i32
    %c0_i32_0 = arith.constant 0 : i32
    %c0_i32_1 = arith.constant 0 : i32
    return %c0_i32, %c0_i32_0 : i32, i32
  }
  func.func @transform_5(%arg0: i32) -> (i32, i32) {
    %c0_i32 = arith.constant 0 : i32
    %c0_i32_0 = arith.constant 0 : i32
    %c0_i32_1 = arith.constant 0 : i32
    return %c0_i32, %c0_i32_0 : i32, i32
  }
  func.func @transform_6(%arg0: i32) -> (i32, i32) {
    %c0_i32 = arith.constant 0 : i32
    %c0_i32_0 = arith.constant 0 : i32
    %c0_i32_1 = arith.constant 0 : i32
    return %c0_i32, %c0_i32_0 : i32, i32
  }
  func.func @transform_7(%arg0: i32) -> (i32, i32) {
    %c0_i32 = arith.constant 0 : i32
    %c0_i32_0 = arith.constant 0 : i32
    %c0_i32_1 = arith.constant 0 : i32
    return %c0_i32, %c0_i32_0 : i32, i32
  }
  func.func @transform_8(%arg0: i32) -> (i32, i32) {
    %c0_i32 = arith.constant 0 : i32
    %c0_i32_0 = arith.constant 0 : i32
    %c0_i32_1 = arith.constant 0 : i32
    return %c0_i32, %c0_i32_0 : i32, i32
  }
  func.func @transform_9(%arg0: i32) -> (i32, i32) {
    %c0_i32 = arith.constant 0 : i32
    %c0_i32_0 = arith.constant 0 : i32
    %c0_i32_1 = arith.constant 0 : i32
    return %c0_i32, %c0_i32_0 : i32, i32
  }
  func.func @transform_10(%arg0: i32) -> (i32, i32) {
    %c0_i32 = arith.constant 0 : i32
    %c0_i32_0 = arith.constant 0 : i32
    %c0_i32_1 = arith.constant 0 : i32
    return %c0_i32, %c0_i32_0 : i32, i32
  }
  func.func @transform_11(%arg0: i32) -> (i32, i32) {
    %c0_i32 = arith.constant 0 : i32
    %c0_i32_0 = arith.constant 0 : i32
    %c0_i32_1 = arith.constant 0 : i32
    return %c0_i32, %c0_i32_0 : i32, i32
  }
  func.func @transform_12(%arg0: i32) -> (i32, i32) {
    %c0_i32 = arith.constant 0 : i32
    %c0_i32_0 = arith.constant 0 : i32
    %c0_i32_1 = arith.constant 0 : i32
    return %c0_i32, %c0_i32_0 : i32, i32
  }
  func.func @transform_13(%arg0: i32) -> (i32, i32) {
    %c0_i32 = arith.constant 0 : i32
    %c0_i32_0 = arith.constant 0 : i32
    %c0_i32_1 = arith.constant 0 : i32
    return %c0_i32, %c0_i32_0 : i32, i32
  }
  func.func @transform_14(%arg0: i32) -> (i32, i32) {
    %c0_i32 = arith.constant 0 : i32
    %c0_i32_0 = arith.constant 0 : i32
    %c0_i32_1 = arith.constant 0 : i32
    return %c0_i32, %c0_i32_0 : i32, i32
  }
  func.func @transform_15(%arg0: i32) -> (i32, i32) {
    %c0_i32 = arith.constant 0 : i32
    %c0_i32_0 = arith.constant 0 : i32
    %c0_i32_1 = arith.constant 0 : i32
    return %c0_i32, %c0_i32_0 : i32, i32
  }
  func.func @transform_16(%arg0: i32) -> (i32, i32) {
    %c0_i32 = arith.constant 0 : i32
    %c0_i32_0 = arith.constant 0 : i32
    %c0_i32_1 = arith.constant 0 : i32
    return %c0_i32, %c0_i32_0 : i32, i32
  }
  func.func @transform_17(%arg0: i32) -> (i32, i32) {
    %c0_i32 = arith.constant 0 : i32
    %c0_i32_0 = arith.constant 0 : i32
    return %arg0, %c0_i32 : i32, i32
  }
}

</mosaic_0001>

<bundles_post_ra>
// kernel: george_sae_forward.1
= control target key start
LH: loop header
LB: loop body
LE: loop exit
PB: predicated region body
PF: predicated region fallthrough
CT: control target
= control target key end

     0   :  { %s3222_s24 = smov 0   ;;  %s3730_s0 = inlined_call_operand.vmem [shape: bf16[256,32], index: 0, kind: input, shape index: {}]   ;;  %s3731_s1 = inlined_call_operand.vmem [shape: bf16[32,256], index: 1, kind: input, shape index: {}]   ;;  %s3732_s2 = inlined_call_operand.vmem [shape: f32[1,256], index: 2, kind: input, shape index: {}]   ;;  %s3733_s3 = inlined_call_operand.vmem [shape: bf16[256,128], index: 3, kind: input, shape index: {}]   ;;  %s3734_s4 = inlined_call_operand.vmem [shape: f32[1,128], index: 4, kind: input, shape index: {}]   ;;  %s3735_s5 = inlined_call_operand.vmem [shape: bf16[128,64], index: 5, kind: input, shape index: {}]   ;;  %s3736_s6 = inlined_call_operand.vmem [shape: f32[1,64], index: 6, kind: input, shape index: {}]   ;;  %s3737_s7 = inlined_call_operand.vmem [shape: bf16[64,8], index: 7, kind: input, shape index: {}]   ;;  %s3738_s8 = inlined_call_operand.vmem [shape: f32[1,8], index: 8, kind: input, shape index: {}]   ;;  %s3739_s9 = inlined_call_operand.vmem [shape: bf16[8,64], index: 9, kind: input, shape index: {}]   ;;  %s3740_s10 = inlined_call_operand.vmem [shape: f32[1,64], index: 10, kind: input, shape index: {}]   ;;  %s3741_s11 = inlined_call_operand.vmem [shape: bf16[64,128], index: 11, kind: input, shape index: {}]   ;;  %s3742_s12 = inlined_call_operand.vmem [shape: f32[1,128], index: 12, kind: input, shape index: {}]   ;;  %s3743_s13 = inlined_call_operand.vmem [shape: bf16[128,256], index: 13, kind: input, shape index: {}]   ;;  %s3744_s14 = inlined_call_operand.vmem [shape: f32[1,256], index: 14, kind: input, shape index: {}]   ;;  %s3745_s15 = inlined_call_operand.vmem [shape: bf16[256,128], index: 15, kind: input, shape index: {}]   ;;  %s3746_s16 = inlined_call_operand.vmem [shape: f32[1,128], index: 16, kind: input, shape index: {}]   ;;  %s3747_s17 = inlined_call_operand.vmem [shape: f32[256,128], index: 17, kind: output, shape index: {}]  }
   0x1   :  { %3749 = sst [smem:[#allocation2_spill]] %s3730_s0 }
   0x2   :  { %3750 = sst [smem:[#allocation3_spill]] %s3731_s1 }
   0x3 LB: > { %s2619_s25 = sadd.s32 4294967295, %s3129_s24   ;;  %p2623_p0 = scmp.ge.s32.totalorder %s3129_s24, 1  ;;  %s3129_s24 = sphi %s3222_s24, %s27_s24  }
   0x4   : > { %p488_p1 = scmp.lt.s32.totalorder %s3129_s24, 3 }
   0x6   : > { %p489_p2 = pnand %p2623_p0, %p488_p1 }
   0x7   : > { %s3751_s28 = sld [smem:[#allocation3_spill]] (!%p489_p2)  ;;  %s2624_s29 = sshll.u32 (!%p489_p2), %s2619_s25, 4  ;;  %v3131_v2 = vmov (!%p489_p2), 0   ;;  %v3051_v5 = vld [vmem:[%s3733_s3 + $0x40] sm:$0xff] (!%p489_p2)   ;;  %v3053_v7 = vld [vmem:[%s3733_s3 + $0x48] sm:$0xff] (!%p489_p2)   ;;  %vm645_vm0 = vcmask (!%p489_p2), 261120   ;;  %v575_v35 = vlaneseq (!%p489_p2) }
   0x8   : > { %492 = sbr.rel (%p489_p2) target bundleno = 1864 (0x748), region = 88  ;;  %702 = vmatprep.mubr.bf16.mxu0 (!%p489_p2), %v3131_v2  ;;  %p541_p3 = scmp.lt.s32.totalorder (!%p489_p2), %s2624_s29, 31  ;;  %v3052_v6 = vld [vmem:[%s3733_s3] sm:$0xff] (!%p489_p2)   ;;  %2744 = vmatprep.subr.bf16.mxu1 (!%p489_p2), %v3051_v5  ;;  %v3054_v8 = vld [vmem:[%s3733_s3 + $0x8] sm:$0xff] (!%p489_p2)   ;;  %v3055_v11 = vld [vmem:[%s3733_s3 + $0x50] sm:$0xff] (!%p489_p2)  }
   0x9   : > { %s3752_s19 = sld [smem:[#allocation2_spill]] (!%p489_p2)  ;;  %2745 = vmatpush3.bf16.msra.mxu1 (!%p489_p2), %v3052_v6  ;;  %v3056_v12 = vld [vmem:[%s3733_s3 + $0x10] sm:$0xff] (!%p489_p2)   ;;  %v3057_v13 = vld [vmem:[%s3733_s3 + $0x58] sm:$0xff] (!%p489_p2)   ;;  %v3059_v15 = vld [vmem:[%s3733_s3 + $0x60] sm:$0xff] (!%p489_p2)   ;;  %v3340_v36 = vshrl.u32 (!%p489_p2), %v575_v35, 7 }
   0xa   : > { %2746 = vmatprep.subr.bf16.mxu1 (!%p489_p2), %v3053_v7  ;;  %v3058_v14 = vld [vmem:[%s3733_s3 + $0x18] sm:$0xff] (!%p489_p2)   ;;  %v3060_v17 = vld [vmem:[%s3733_s3 + $0x20] sm:$0xff] (!%p489_p2)   ;;  %v3061_v23 = vld [vmem:[%s3733_s3 + $0x68] sm:$0xff] (!%p489_p2)  }
   0xb   : > { %v3062_v24 = vld [vmem:[%s3733_s3 + $0x28] sm:$0xff] (!%p489_p2)   ;;  %v3063_v25 = vld [vmem:[%s3733_s3 + $0x70] sm:$0xff] (!%p489_p2)   ;;  %v3065_v27 = vld [vmem:[%s3733_s3 + $0x78] sm:$0xff] (!%p489_p2)   ;;  %v577_v37 = vsub.s32 (!%p489_p2), 0, %v3340_v36  ;;  %v581_v39 = vsub.s32 (!%p489_p2), 1, %v3340_v36 }
   0xc   : > { %v3064_v26 = vld [vmem:[%s3733_s3 + $0x30] sm:$0xff] (!%p489_p2)   ;;  %v3066_v28 = vld [vmem:[%s3733_s3 + $0x38] sm:$0xff] (!%p489_p2)   ;;  %v3067_v29 = vld [vmem:[%s3735_s5] sm:$0xff] (!%p489_p2)  }
   0xd   : > { %v3037_v0 = vld [vmem:[%s3751_s28 + $0x4] ss:$8 sps:$4 sm:$0xff] (!%p489_p2)   ;;  %v3039_v1 = vld [vmem:[%s3751_s28] ss:$8 sps:$4 sm:$0xff] (!%p489_p2)   ;;  %v3040_v3 = vld [vmem:[%s3751_s28 + $0x14] ss:$8 sps:$4 sm:$0xff] (!%p489_p2)   ;;  %2747 = vmatpush3.bf16.msra.mxu1 (!%p489_p2), %v3054_v8 }
   0xe   : > { %670 = vmatprep.subr.bf16.mxu0 (!%p489_p2), %v3037_v0  ;;  %v3042_v4 = vld [vmem:[%s3751_s28 + $0x10] ss:$8 sps:$4 sm:$0xff] (!%p489_p2)   ;;  %2748 = vmatprep.subr.bf16.mxu1 (!%p489_p2), %v3055_v11  ;;  %v3068_v30 = vld [vmem:[%s3735_s5 + $0x8] sm:$0xff] (!%p489_p2)   ;;  %v3071_v33 = vld [vmem:[%s3735_s5 + $0x20] sm:$0xff] (!%p489_p2)  }
   0xf   : > { %671 = vmatpush1.bf16.msra.mxu0 %v3039_v1  ;;  %s3754_s29 = smov (!%p541_p3, %s2624_s29), 31  ;;  %v3069_v31 = vld [vmem:[%s3735_s5 + $0x10] sm:$0xff]   ;;  %v3070_v32 = vld [vmem:[%s3735_s5 + $0x18] sm:$0xff]   ;;  %v3072_v34 = vld [vmem:[%s3735_s5 + $0x28] sm:$0xff]  }
  0x10   : > { %672 = vmatprep.subr.bf16.mxu0 %v3040_v3  ;;  %s2625_s26 = sshll.u32 %s3754_s29, 2  ;;  %v573_v38 = vld [vmem:[%s3732_s2] sm:$0x3]  ;;  %s2627_s0 = sshll.u32 %s3754_s29, 3 }
  0x11   : > { %s3258_s1 = scalar_lea.vmem %s3752_s19, %s2625_s26  ;;  %2749 = vmatpush3.bf16.msra.mxu1 %v3056_v12  ;;  %v3349_v40 = vrot.slane %v573_v38, %v577_v37  ;;  %v3353_v41 = vrot.slane %v573_v38, %v581_v39  ;;  %s3693_s20 = scalar_lea.vmem %s3747_s17, %s2627_s0 }
  0x12   : > { %v3043_v9 = vld [vmem:[%s3258_s1] sm:$0xff]   ;;  %v3044_v10 = vld [vmem:[%s3258_s1 + $0x8] sm:$0xff]   ;;  %2750 = vmatprep.subr.bf16.mxu1 %v3057_v13  ;;  %v3045_v16 = vld [vmem:[%s3258_s1 + $0x10] sm:$0xff]  }
  0x13   : > { %673 = vmatpush1.bf16.msra.mxu0 %v3042_v4  ;;  %v3046_v18 = vld [vmem:[%s3258_s1 + $0x18] sm:$0xff]   ;;  %v3047_v19 = vld [vmem:[%s3258_s1 + $0x20] sm:$0xff]   ;;  %v3048_v20 = vld [vmem:[%s3258_s1 + $0x28] sm:$0xff]  }
  0x14   : > { %v3049_v21 = vld [vmem:[%s3258_s1 + $0x30] sm:$0xff]   ;;  %v3050_v22 = vld [vmem:[%s3258_s1 + $0x38] sm:$0xff]   ;;  %2921 = vmatprep.subr.bf16.mxu0 %v3067_v29 }
  0x15   : > { %2751 = vmatpush3.bf16.msra.mxu1 %v3058_v14 }
  0x16   : > { %2640 = vmatmul.mubr.msk.bf16.vlgmr.msra.gmra.mrb[0].mxu0 %vm645_vm0, %v3043_v9  ;;  %2752 = vmatprep.subr.bf16.mxu1 %v3059_v15 }
  0x17   : > { %712 = vmatprep.mubr.bf16.mxu0 %v3131_v2  ;;  %2922 = vmatpush3.bf16.msra.mxu0 %v3067_v29 }
  0x18   : > { %2923 = vmatprep.subr.bf16.mxu0 %v3068_v30 }
  0x19   : > { %2753 = vmatpush3.bf16.msra.mxu1 %v3060_v17 }
  0x1a   : > { %2754 = vmatprep.subr.bf16.mxu1 %v3061_v23 }
  0x1b   : > { %2924 = vmatpush3.bf16.msra.mxu0 %v3068_v30 }
  0x1c   : > { %2925 = vmatprep.subr.bf16.mxu0 %v3069_v31 }
  0x1d   : > { %2755 = vmatpush3.bf16.msra.mxu1 %v3062_v24 }
  0x1e   : > { %2641 = vmatmul.mubr.msk.bf16.gmra.mrb[4].mxu0 %vm645_vm0, %v3044_v10  ;;  %2756 = vmatprep.subr.bf16.mxu1 %v3063_v25 }
  0x1f   : > { %722 = vmatprep.mubr.bf16.mxu0 %v3131_v2  ;;  %2926 = vmatpush3.bf16.msra.mxu0 %v3069_v31 }
  0x20   : > { %2927 = vmatprep.subr.bf16.mxu0 %v3070_v32 }
  0x21   : > { %2757 = vmatpush3.bf16.msra.mxu1 %v3064_v26 }
  0x22   : > { %2758 = vmatprep.subr.bf16.mxu1 %v3065_v27 }
  0x23   : > { %2928 = vmatpush3.bf16.msra.mxu0 %v3070_v32 }
  0x24   : > { %2929 = vmatprep.subr.bf16.mxu0 %v3071_v33 }
  0x25   : > { %2759 = vmatpush3.bf16.msra.mxu1 %v3066_v28 }
  0x26   : > { %2642 = vmatmul.mubr.msk.bf16.gmra.mrb[8].mxu0 %vm645_vm0, %v3045_v16 }
  0x27   : > { %732 = vmatprep.mubr.bf16.mxu0 %v3131_v2  ;;  %2930 = vmatpush3.bf16.msra.mxu0 %v3071_v33 }
  0x28   : > { %2931 = vmatprep.subr.bf16.mxu0 %v3072_v34 }
  0x2b   : > { %2932 = vmatpush3.bf16.msra.mxu0 %v3072_v34 }
  0x2e   : > { %2643 = vmatmul.mubr.msk.bf16.gmra.mrb[12].mxu0 %vm645_vm0, %v3046_v18 }
  0x2f   : > { %742 = vmatprep.mubr.bf16.mxu0 %v3131_v2 }
  0x36   : > { %2644 = vmatmul.mubr.msk.bf16.gmra.mrb[16].mxu0 %vm645_vm0, %v3047_v19 }
  0x37   : > { %752 = vmatprep.mubr.bf16.mxu0 %v3131_v2 }
  0x3e   : > { %2645 = vmatmul.mubr.msk.bf16.gmra.mrb[20].mxu0 %vm645_vm0, %v3048_v20 }
  0x3f   : > { %762 = vmatprep.mubr.bf16.mxu0 %v3131_v2 }
  0x46   : > { %2646 = vmatmul.mubr.msk.bf16.gmra.mrb[24].mxu0 %vm645_vm0, %v3049_v21 }
  0x47   : > { %772 = vmatprep.mubr.bf16.mxu0 %v3131_v2 }
  0x4e   : > { %2647 = vmatmul.mubr.msk.bf16.gmra.mrb[28].mxu0 %vm645_vm0, %v3050_v22 }
  0xe9   : > { %v704_v42 = vpop.f32.mrb[0].mxu0 }
  0xea   : > { %v705_v43 = vadd.f32 %v704_v42, %v3349_v40  ;;  %v706_v44 = vpop.f32.mrb[1].mxu0 }
  0xeb   : > { %v707_v45 = vadd.f32 %v706_v44, %v3353_v41  ;;  %v708_v46 = vpop.f32.mrb[2].mxu0 }
  0xec   : > { %v815_v47 = vmul.f32 0.01, %v705_v43  ;;  %v709_v48 = vadd.f32 %v708_v46, %v3349_v40  ;;  %v710_v49 = vpop.f32.mrb[3].mxu0  ;;  %vm783_vm1 = vcmp.gt.f32.partialorder %v705_v43, 0.0 }
  0xed   : > { %v816_v50 = vmul.f32 0.01, %v707_v45  ;;  %v711_v51 = vadd.f32 %v710_v49, %v3353_v41  ;;  %vm784_vm3 = vcmp.gt.f32.partialorder %v707_v45, 0.0 }
  0xee   : > { %vm785_vm2 = vcmp.gt.f32.partialorder %v709_v48, 0.0  ;;  %v817_v52 = vmul.f32 0.01, %v709_v48  ;;  %v847_v54 = vsel %vm783_vm1, %v705_v43, %v815_v47 }
  0xef   : > { %v818_v53 = vmul.f32 0.01, %v711_v51  ;;  %vm786_vm4 = vcmp.gt.f32.partialorder %v711_v51, 0.0  ;;  %v848_v57 = vsel %vm784_vm3, %v707_v45, %v816_v50 }
  0xf0   : > { %v849_v55 = vsel %vm785_vm2, %v709_v48, %v817_v52 }
  0xf1   : > { %v714_v56 = vpop.f32.mrb[4].mxu0  ;;  %v850_v58 = vsel %vm786_vm4, %v711_v51, %v818_v53  ;;  %v879_v59 = vpack.c.bf16 %v849_v55, %v847_v54 }
  0xf2   : > { %v715_v60 = vadd.f32 %v714_v56, %v3349_v40  ;;  %v716_v61 = vpop.f32.mrb[5].mxu0  ;;  %v880_v62 = vpack.c.bf16 %v850_v58, %v848_v57 }
  0xf3   : > { %v717_v63 = vadd.f32 %v716_v61, %v3353_v41  ;;  %v718_v0 = vpop.f32.mrb[6].mxu0 }
  0xf4   : > { %v819_v1 = vmul.f32 0.01, %v715_v60  ;;  %v719_v3 = vadd.f32 %v718_v0, %v3349_v40  ;;  %v720_v4 = vpop.f32.mrb[7].mxu0  ;;  %1062 = vmatprep.mubr.bf16.mxu1 %v880_v62  ;;  %vm787_vm5 = vcmp.gt.f32.partialorder %v715_v60, 0.0 }
  0xf5   : > { %v820_v5 = vmul.f32 0.01, %v717_v63  ;;  %v721_v6 = vadd.f32 %v720_v4, %v3353_v41  ;;  %1063 = vmatmul.mubr.bf16.vlgmr.msra.gmra.mrb[0].mxu1 %v879_v59  ;;  %vm788_vm6 = vcmp.gt.f32.partialorder %v717_v63, 0.0 }
  0xf6   : > { %vm789_vm7 = vcmp.gt.f32.partialorder %v719_v3, 0.0  ;;  %v821_v7 = vmul.f32 0.01, %v719_v3  ;;  %v851_v9 = vsel %vm787_vm5, %v715_v60, %v819_v1 }
  0xf7   : > { %vm790_vm8 = vcmp.gt.f32.partialorder %v721_v6, 0.0  ;;  %v822_v8 = vmul.f32 0.01, %v721_v6  ;;  %v852_v12 = vsel %vm788_vm6, %v717_v63, %v820_v5 }
  0xf8   : > { %v853_v10 = vsel %vm789_vm7, %v719_v3, %v821_v7 }
  0xf9   : > { %v724_v11 = vpop.f32.mrb[8].mxu0  ;;  %v854_v13 = vsel %vm790_vm8, %v721_v6, %v822_v8  ;;  %v881_v14 = vpack.c.bf16 %v853_v10, %v851_v9 }
  0xfa   : > { %v725_v15 = vadd.f32 %v724_v11, %v3349_v40  ;;  %v726_v16 = vpop.f32.mrb[9].mxu0  ;;  %v882_v17 = vpack.c.bf16 %v854_v13, %v852_v12 }
  0xfb   : > { %v727_v18 = vadd.f32 %v726_v16, %v3353_v41  ;;  %v728_v19 = vpop.f32.mrb[10].mxu0 }
  0xfc   : > { %v823_v20 = vmul.f32 0.01, %v725_v15  ;;  %v729_v21 = vadd.f32 %v728_v19, %v3349_v40  ;;  %v730_v22 = vpop.f32.mrb[11].mxu0  ;;  %1070 = vmatprep.mubr.bf16.mxu1 %v882_v17  ;;  %vm791_vm9 = vcmp.gt.f32.partialorder %v725_v15, 0.0 }
  0xfd   : > { %v824_v23 = vmul.f32 0.01, %v727_v18  ;;  %v731_v24 = vadd.f32 %v730_v22, %v3353_v41  ;;  %1071 = vmatmul.mubr.bf16.gmra.mrb[4].mxu1 %v881_v14  ;;  %vm792_vm10 = vcmp.gt.f32.partialorder %v727_v18, 0.0 }
  0xfe   : > { %vm793_vm11 = vcmp.gt.f32.partialorder %v729_v21, 0.0  ;;  %v825_v25 = vmul.f32 0.01, %v729_v21  ;;  %v855_v27 = vsel %vm791_vm9, %v725_v15, %v823_v20 }
  0xff   : > { %vm794_vm12 = vcmp.gt.f32.partialorder %v731_v24, 0.0  ;;  %v826_v26 = vmul.f32 0.01, %v731_v24  ;;  %v856_v30 = vsel %vm792_vm10, %v727_v18, %v824_v23 }
 0x100   : > { %v857_v28 = vsel %vm793_vm11, %v729_v21, %v825_v25 }
 0x101   : > { %v734_v29 = vpop.f32.mrb[12].mxu0  ;;  %v858_v31 = vsel %vm794_vm12, %v731_v24, %v826_v26  ;;  %v883_v32 = vpack.c.bf16 %v857_v28, %v855_v27 }
 0x102   : > { %v735_v33 = vadd.f32 %v734_v29, %v3349_v40  ;;  %v736_v34 = vpop.f32.mrb[13].mxu0  ;;  %v884_v35 = vpack.c.bf16 %v858_v31, %v856_v30 }
 0x103   : > { %v737_v38 = vadd.f32 %v736_v34, %v3353_v41  ;;  %v738_v42 = vpop.f32.mrb[14].mxu0 }
 0x104   : > { %v827_v43 = vmul.f32 0.01, %v735_v33  ;;  %v739_v44 = vadd.f32 %v738_v42, %v3349_v40  ;;  %v740_v45 = vpop.f32.mrb[15].mxu0  ;;  %1078 = vmatprep.mubr.bf16.mxu1 %v884_v35  ;;  %vm795_vm13 = vcmp.gt.f32.partialorder %v735_v33, 0.0 }
 0x105   : > { %v828_v46 = vmul.f32 0.01, %v737_v38  ;;  %v741_v47 = vadd.f32 %v740_v45, %v3353_v41  ;;  %1079 = vmatmul.mubr.bf16.gmra.mrb[8].mxu1 %v883_v32  ;;  %vm796_vm14 = vcmp.gt.f32.partialorder %v737_v38, 0.0 }
 0x106   : > { %vm797_vm15 = vcmp.gt.f32.partialorder %v739_v44, 0.0  ;;  %v829_v48 = vmul.f32 0.01, %v739_v44  ;;  %v859_v50 = vsel %vm795_vm13, %v735_v33, %v827_v43 }
 0x107   : > { %vm798_vm0 = vcmp.gt.f32.partialorder %v741_v47, 0.0  ;;  %v830_v49 = vmul.f32 0.01, %v741_v47  ;;  %v860_v53 = vsel %vm796_vm14, %v737_v38, %v828_v46 }
 0x108   : > { %v861_v51 = vsel %vm797_vm15, %v739_v44, %v829_v48 }
 0x109   : > { %v744_v52 = vpop.f32.mrb[16].mxu0  ;;  %v862_v54 = vsel %vm798_vm0, %v741_v47, %v830_v49  ;;  %v885_v55 = vpack.c.bf16 %v861_v51, %v859_v50 }
 0x10a   : > { %v745_v56 = vadd.f32 %v744_v52, %v3349_v40  ;;  %v746_v57 = vpop.f32.mrb[17].mxu0  ;;  %v886_v58 = vpack.c.bf16 %v862_v54, %v860_v53 }
 0x10b   : > { %v747_v59 = vadd.f32 %v746_v57, %v3353_v41  ;;  %v748_v60 = vpop.f32.mrb[18].mxu0 }
 0x10c   : > { %v831_v61 = vmul.f32 0.01, %v745_v56  ;;  %v749_v62 = vadd.f32 %v748_v60, %v3349_v40  ;;  %v750_v63 = vpop.f32.mrb[19].mxu0  ;;  %1086 = vmatprep.mubr.bf16.mxu1 %v886_v58  ;;  %vm799_vm1 = vcmp.gt.f32.partialorder %v745_v56, 0.0 }
 0x10d   : > { %v832_v0 = vmul.f32 0.01, %v747_v59  ;;  %v751_v1 = vadd.f32 %v750_v63, %v3353_v41  ;;  %1087 = vmatmul.mubr.bf16.gmra.mrb[12].mxu1 %v885_v55  ;;  %vm800_vm2 = vcmp.gt.f32.partialorder %v747_v59, 0.0 }
 0x10e   : > { %vm801_vm3 = vcmp.gt.f32.partialorder %v749_v62, 0.0  ;;  %v833_v3 = vmul.f32 0.01, %v749_v62  ;;  %v863_v5 = vsel %vm799_vm1, %v745_v56, %v831_v61 }
 0x10f   : > { %vm802_vm4 = vcmp.gt.f32.partialorder %v751_v1, 0.0  ;;  %v834_v4 = vmul.f32 0.01, %v751_v1  ;;  %v864_v8 = vsel %vm800_vm2, %v747_v59, %v832_v0 }
 0x110   : > { %v865_v6 = vsel %vm801_vm3, %v749_v62, %v833_v3 }
 0x111   : > { %v754_v7 = vpop.f32.mrb[20].mxu0  ;;  %v866_v9 = vsel %vm802_vm4, %v751_v1, %v834_v4  ;;  %v887_v10 = vpack.c.bf16 %v865_v6, %v863_v5 }
 0x112   : > { %v755_v11 = vadd.f32 %v754_v7, %v3349_v40  ;;  %v756_v12 = vpop.f32.mrb[21].mxu0  ;;  %v888_v13 = vpack.c.bf16 %v866_v9, %v864_v8  ;;  %v3075_v7 = vld [vmem:[%s3737_s7] sm:$0xff]   ;;  %v3076_v8 = vld [vmem:[%s3737_s7 + $0x8] sm:$0xff]   ;;  %v3402_v9 = vld [vmem:[%s3737_s7 + $0x10] sm:$0xff]  }
 0x113   : > { %v757_v14 = vadd.f32 %v756_v12, %v3353_v41  ;;  %v758_v15 = vpop.f32.mrb[22].mxu0  ;;  %3019 = vmatprep.subr.bf16.mxu1 %v3075_v7 }
 0x114   : > { %v835_v16 = vmul.f32 0.01, %v755_v11  ;;  %v759_v17 = vadd.f32 %v758_v15, %v3349_v40  ;;  %v760_v18 = vpop.f32.mrb[23].mxu0  ;;  %1094 = vmatprep.mubr.bf16.mxu1 %v888_v13  ;;  %vm803_vm5 = vcmp.gt.f32.partialorder %v755_v11, 0.0  ;;  %3023 = vmatpush3.bf16.msra.mxu1 %v3075_v7 }
 0x115   : > { %v836_v19 = vmul.f32 0.01, %v757_v14  ;;  %v761_v20 = vadd.f32 %v760_v18, %v3353_v41  ;;  %1095 = vmatmul.mubr.bf16.gmra.mrb[16].mxu1 %v887_v10  ;;  %vm804_vm6 = vcmp.gt.f32.partialorder %v757_v14, 0.0  ;;  %3020 = vmatprep.subr.bf16.mxu1 %v3076_v8 }
 0x116   : > { %vm805_vm7 = vcmp.gt.f32.partialorder %v759_v17, 0.0  ;;  %v837_v21 = vmul.f32 0.01, %v759_v17  ;;  %v867_v23 = vsel %vm803_vm5, %v755_v11, %v835_v16  ;;  %v3409_v11 = vld [vmem:[%s3734_s4] ss:$0 sm:$0xff] }
 0x117   : > { %vm806_vm8 = vcmp.gt.f32.partialorder %v761_v20, 0.0  ;;  %v838_v22 = vmul.f32 0.01, %v761_v20  ;;  %v868_v26 = vsel %vm804_vm6, %v757_v14, %v836_v19 }
 0x118   : > { %v869_v24 = vsel %vm805_vm7, %v759_v17, %v837_v21  ;;  %3024 = vmatpush3.bf16.msra.mxu1 %v3076_v8 }
 0x119   : > { %v764_v25 = vpop.f32.mrb[24].mxu0  ;;  %v870_v27 = vsel %vm806_vm8, %v761_v20, %v838_v22  ;;  %v889_v28 = vpack.c.bf16 %v869_v24, %v867_v23  ;;  %3021 = vmatprep.subr.bf16.mxu1 %v3402_v9 }
 0x11a   : > { %v765_v29 = vadd.f32 %v764_v25, %v3349_v40  ;;  %v766_v30 = vpop.f32.mrb[25].mxu0  ;;  %v890_v31 = vpack.c.bf16 %v870_v27, %v868_v26 }
 0x11b   : > { %v767_v32 = vadd.f32 %v766_v30, %v3353_v41  ;;  %v768_v33 = vpop.f32.mrb[26].mxu0 }
 0x11c   : > { %v839_v34 = vmul.f32 0.01, %v765_v29  ;;  %v769_v35 = vadd.f32 %v768_v33, %v3349_v40  ;;  %v770_v38 = vpop.f32.mrb[27].mxu0  ;;  %1102 = vmatprep.mubr.bf16.mxu1 %v890_v31  ;;  %vm807_vm9 = vcmp.gt.f32.partialorder %v765_v29, 0.0  ;;  %3025 = vmatpush3.bf16.msra.mxu1 %v3402_v9 }
 0x11d   : > { %v840_v42 = vmul.f32 0.01, %v767_v32  ;;  %v771_v43 = vadd.f32 %v770_v38, %v3353_v41  ;;  %1103 = vmatmul.mubr.bf16.gmra.mrb[20].mxu1 %v889_v28  ;;  %vm808_vm10 = vcmp.gt.f32.partialorder %v767_v32, 0.0 }
 0x11e   : > { %vm809_vm11 = vcmp.gt.f32.partialorder %v769_v35, 0.0  ;;  %v841_v44 = vmul.f32 0.01, %v769_v35  ;;  %v871_v46 = vsel %vm807_vm9, %v765_v29, %v839_v34 }
 0x11f   : > { %vm810_vm12 = vcmp.gt.f32.partialorder %v771_v43, 0.0  ;;  %v842_v45 = vmul.f32 0.01, %v771_v43  ;;  %v872_v49 = vsel %vm808_vm10, %v767_v32, %v840_v42 }
 0x120   : > { %v873_v47 = vsel %vm809_vm11, %v769_v35, %v841_v44 }
 0x121   : > { %v774_v48 = vpop.f32.mrb[28].mxu0  ;;  %v874_v50 = vsel %vm810_vm12, %v771_v43, %v842_v45  ;;  %v891_v51 = vpack.c.bf16 %v873_v47, %v871_v46 }
 0x122   : > { %v775_v52 = vadd.f32 %v774_v48, %v3349_v40  ;;  %v776_v53 = vpop.f32.mrb[29].mxu0  ;;  %v892_v54 = vpack.c.bf16 %v874_v50, %v872_v49 }
 0x123   : > { %v777_v55 = vadd.f32 %v776_v53, %v3353_v41  ;;  %v778_v56 = vpop.f32.mrb[30].mxu0 }
 0x124   : > { %v843_v57 = vmul.f32 0.01, %v775_v52  ;;  %v779_v58 = vadd.f32 %v778_v56, %v3349_v40  ;;  %v780_v59 = vpop.f32.mrb[31].mxu0  ;;  %1110 = vmatprep.mubr.bf16.mxu1 %v892_v54  ;;  %vm811_vm13 = vcmp.gt.f32.partialorder %v775_v52, 0.0  ;;  %v3073_v40 = vld [vmem:[%s3735_s5 + $0x30] sm:$0xff]  }
 0x125   : > { %v844_v60 = vmul.f32 0.01, %v777_v55  ;;  %v781_v61 = vadd.f32 %v780_v59, %v3353_v41  ;;  %1111 = vmatmul.mubr.bf16.gmra.mrb[24].mxu1 %v891_v51  ;;  %vm812_vm14 = vcmp.gt.f32.partialorder %v777_v55, 0.0  ;;  %2933 = vmatprep.subr.bf16.mxu0 %v3073_v40  ;;  %v3074_v41 = vld [vmem:[%s3735_s5 + $0x38] sm:$0xff]  }
 0x126   : > { %vm813_vm15 = vcmp.gt.f32.partialorder %v779_v58, 0.0  ;;  %v845_v62 = vmul.f32 0.01, %v779_v58  ;;  %v875_v0 = vsel %vm811_vm13, %v775_v52, %v843_v57  ;;  %2934 = vmatpush3.bf16.msra.mxu0 %v3073_v40 }
 0x127   : > { %vm814_vm0 = vcmp.gt.f32.partialorder %v781_v61, 0.0  ;;  %v846_v63 = vmul.f32 0.01, %v781_v61  ;;  %v876_v3 = vsel %vm812_vm14, %v777_v55, %v844_v60  ;;  %2935 = vmatprep.subr.bf16.mxu0 %v3074_v41 }
 0x128   : > { %v877_v1 = vsel %vm813_vm15, %v779_v58, %v845_v62 }
 0x129   : > { %v878_v4 = vsel %vm814_vm0, %v781_v61, %v846_v63  ;;  %v893_v5 = vpack.c.bf16 %v877_v1, %v875_v0 }
 0x12a   : > { %v894_v6 = vpack.c.bf16 %v878_v4, %v876_v3  ;;  %2936 = vmatpush3.bf16.msra.mxu0 %v3074_v41 }
 0x12b   : > { %2953 = vmatprep.subr.bf16.mxu0 %v3075_v7 }
 0x12c   : > { %1118 = vmatprep.mubr.bf16.mxu1 %v894_v6 }
 0x12d   : > { %1119 = vmatmul.mubr.bf16.gmra.mrb[28].mxu1 %v893_v5 }
 0x1c8   : > { %v2760_v10 = vpop.f32.mrb[0].mxu1 }
 0x1c9   : > { %v2761_v12 = vpop.f32.mrb[1].mxu1 }
 0x1ca   : > { %v2762_v13 = vadd.f32 %v2761_v12, %v2760_v10  ;;  %v2763_v14 = vpop.f32.mrb[2].mxu1 }
 0x1cb   : > { %v2764_v15 = vpop.f32.mrb[3].mxu1 }
 0x1cc   : > { %v1065_v16 = vadd.f32 %v2762_v13, %v3409_v11  ;;  %v2765_v17 = vadd.f32 %v2764_v15, %v2763_v14 }
 0x1ce   : > { %v1143_v18 = vmul.f32 0.01, %v1065_v16  ;;  %v1068_v19 = vadd.f32 %v2765_v17, %v3409_v11  ;;  %vm1127_vm1 = vcmp.gt.f32.partialorder %v1065_v16, 0.0 }
 0x1d0   : > { %vm1128_vm2 = vcmp.gt.f32.partialorder %v1068_v19, 0.0  ;;  %v1144_v20 = vmul.f32 0.01, %v1068_v19  ;;  %v2766_v21 = vpop.f32.mrb[4].mxu1  ;;  %v1159_v25 = vsel %vm1127_vm1, %v1065_v16, %v1143_v18  ;;  %vm1609_vm1 = vcmask 1043456  }
 0x1d1   : > { %v2767_v22 = vpop.f32.mrb[5].mxu1 }
 0x1d2   : > { %v2768_v23 = vadd.f32 %v2767_v22, %v2766_v21  ;;  %v2769_v24 = vpop.f32.mrb[6].mxu1  ;;  %v1160_v26 = vsel %vm1128_vm2, %v1068_v19, %v1144_v20 }
 0x1d3   : > { %v2770_v27 = vpop.f32.mrb[7].mxu1  ;;  %v1175_v28 = vpack.c.bf16 %v1160_v26, %v1159_v25 }
 0x1d4   : > { %v1073_v29 = vadd.f32 %v2768_v23, %v3409_v11  ;;  %v2771_v30 = vadd.f32 %v2770_v27, %v2769_v24 }
 0x1d5   : > { %2937 = vmatprep.mubr.bf16.mxu0 %v1175_v28 }
 0x1d6   : > { %v1145_v31 = vmul.f32 0.01, %v1073_v29  ;;  %v1076_v32 = vadd.f32 %v2771_v30, %v3409_v11  ;;  %vm1129_vm3 = vcmp.gt.f32.partialorder %v1073_v29, 0.0 }
 0x1d8   : > { %vm1130_vm4 = vcmp.gt.f32.partialorder %v1076_v32, 0.0  ;;  %v1146_v33 = vmul.f32 0.01, %v1076_v32  ;;  %v2772_v34 = vpop.f32.mrb[8].mxu1  ;;  %v1161_v38 = vsel %vm1129_vm3, %v1073_v29, %v1145_v31 }
 0x1d9   : > { %v2773_v35 = vpop.f32.mrb[9].mxu1 }
 0x1da   : > { %v1162_v42 = vsel %vm1130_vm4, %v1076_v32, %v1146_v33  ;;  %v2774_v43 = vadd.f32 %v2773_v35, %v2772_v34  ;;  %v2775_v44 = vpop.f32.mrb[10].mxu1 }
 0x1db   : > { %v1176_v45 = vpack.c.bf16 %v1162_v42, %v1161_v38  ;;  %v2776_v46 = vpop.f32.mrb[11].mxu1 }
 0x1dc   : > { %v1081_v47 = vadd.f32 %v2774_v43, %v3409_v11  ;;  %v2777_v48 = vadd.f32 %v2776_v46, %v2775_v44 }
 0x1dd   : > { %2938 = vmatmul.mubr.bf16.vlgmr.msra.gmra.mrb[32].mxu0 %v1176_v45 }
 0x1de   : > { %v1147_v49 = vmul.f32 0.01, %v1081_v47  ;;  %v1084_v50 = vadd.f32 %v2777_v48, %v3409_v11  ;;  %2954 = vmatpush3.bf16.msra.mxu0 %v3075_v7  ;;  %vm1131_vm5 = vcmp.gt.f32.partialorder %v1081_v47, 0.0 }
 0x1df   : > { %2955 = vmatprep.subr.bf16.mxu0 %v3076_v8 }
 0x1e0   : > { %vm1132_vm6 = vcmp.gt.f32.partialorder %v1084_v50, 0.0  ;;  %v1148_v51 = vmul.f32 0.01, %v1084_v50  ;;  %v2778_v52 = vpop.f32.mrb[12].mxu1  ;;  %v1163_v56 = vsel %vm1131_vm5, %v1081_v47, %v1147_v49 }
 0x1e1   : > { %v2779_v53 = vpop.f32.mrb[13].mxu1 }
 0x1e2   : > { %v2780_v54 = vadd.f32 %v2779_v53, %v2778_v52  ;;  %v2781_v55 = vpop.f32.mrb[14].mxu1  ;;  %v1164_v57 = vsel %vm1132_vm6, %v1084_v50, %v1148_v51  ;;  %2956 = vmatpush3.bf16.msra.mxu0 %v3076_v8  ;;  %vm1446_vm6 = vcmask 523264  }
 0x1e3   : > { %v2782_v58 = vpop.f32.mrb[15].mxu1  ;;  %v1177_v59 = vpack.c.bf16 %v1164_v57, %v1163_v56  ;;  %2957 = vmatprep.subr.bf16.mxu0 %v3402_v9 }
 0x1e4   : > { %v1089_v60 = vadd.f32 %v2780_v54, %v3409_v11  ;;  %v2783_v61 = vadd.f32 %v2782_v58, %v2781_v55 }
 0x1e5   : > { %2941 = vmatprep.mubr.bf16.mxu0 %v1177_v59 }
 0x1e6   : > { %v1149_v62 = vmul.f32 0.01, %v1089_v60  ;;  %v1092_v63 = vadd.f32 %v2783_v61, %v3409_v11  ;;  %2958 = vmatpush3.bf16.msra.mxu0 %v3402_v9  ;;  %vm1133_vm7 = vcmp.gt.f32.partialorder %v1089_v60, 0.0  ;;  %v3078_v61 = vld [vmem:[%s3737_s7 + $0x18] sm:$0xff]  }
 0x1e7   : > { %2959 = vmatprep.subr.bf16.mxu0 %v3078_v61  ;;  %3022 = vmatprep.subr.bf16.mxu1 %v3078_v61 }
 0x1e8   : > { %vm1134_vm8 = vcmp.gt.f32.partialorder %v1092_v63, 0.0  ;;  %v1150_v0 = vmul.f32 0.01, %v1092_v63  ;;  %v2784_v1 = vpop.f32.mrb[16].mxu1  ;;  %v1165_v6 = vsel %vm1133_vm7, %v1089_v60, %v1149_v62  ;;  %3026 = vmatpush3.bf16.msra.mxu1 %v3078_v61  ;;  %v1576_v62 = vld [vmem:[%s3739_s9] sm:$0xf] }
 0x1e9   : > { %v2785_v3 = vpop.f32.mrb[17].mxu1 }
 0x1ea   : > { %v2786_v4 = vadd.f32 %v2785_v3, %v2784_v1  ;;  %v2787_v5 = vpop.f32.mrb[18].mxu1  ;;  %v1166_v40 = vsel %vm1134_vm8, %v1092_v63, %v1150_v0  ;;  %2960 = vmatpush3.bf16.msra.mxu0 %v3078_v61  ;;  %v3438_v63 = vld [vmem:[%s3736_s6] ss:$0 sm:$0xff] }
 0x1eb   : > { %v2788_v41 = vpop.f32.mrb[19].mxu1  ;;  %v1178_v7 = vpack.c.bf16 %v1166_v40, %v1165_v6  ;;  %3027 = vmatprep.subr.msk.bf16.mxu0 %vm1609_vm1, %v1576_v62 }
 0x1ec   : > { %v1097_v8 = vadd.f32 %v2786_v4, %v3409_v11  ;;  %v2789_v10 = vadd.f32 %v2788_v41, %v2787_v5 }
 0x1ed   : > { %2942 = vmatmul.mubr.bf16.gmra.mrb[36].mxu0 %v1178_v7 }
 0x1ee   : > { %v1151_v12 = vmul.f32 0.01, %v1097_v8  ;;  %v1100_v13 = vadd.f32 %v2789_v10, %v3409_v11  ;;  %vm1135_vm9 = vcmp.gt.f32.partialorder %v1097_v8, 0.0 }
 0x1f0   : > { %vm1136_vm10 = vcmp.gt.f32.partialorder %v1100_v13, 0.0  ;;  %v1152_v9 = vmul.f32 0.01, %v1100_v13  ;;  %v2790_v14 = vpop.f32.mrb[20].mxu1  ;;  %v1167_v18 = vsel %vm1135_vm9, %v1097_v8, %v1151_v12 }
 0x1f1   : > { %v2791_v15 = vpop.f32.mrb[21].mxu1 }
 0x1f2   : > { %v2792_v16 = vadd.f32 %v2791_v15, %v2790_v14  ;;  %v2793_v17 = vpop.f32.mrb[22].mxu1  ;;  %v1168_v19 = vsel %vm1136_vm10, %v1100_v13, %v1152_v9 }
 0x1f3   : > { %v2794_v20 = vpop.f32.mrb[23].mxu1  ;;  %v1179_v21 = vpack.c.bf16 %v1168_v19, %v1167_v18 }
 0x1f4   : > { %v1105_v22 = vadd.f32 %v2792_v16, %v3409_v11  ;;  %v2795_v23 = vadd.f32 %v2794_v20, %v2793_v17 }
 0x1f5   : > { %2945 = vmatprep.mubr.bf16.mxu0 %v1179_v21 }
 0x1f6   : > { %v1153_v24 = vmul.f32 0.01, %v1105_v22  ;;  %v1108_v25 = vadd.f32 %v2795_v23, %v3409_v11  ;;  %vm1137_vm11 = vcmp.gt.f32.partialorder %v1105_v22, 0.0 }
 0x1f8   : > { %vm1138_vm12 = vcmp.gt.f32.partialorder %v1108_v25, 0.0  ;;  %v1154_v26 = vmul.f32 0.01, %v1108_v25  ;;  %v2796_v27 = vpop.f32.mrb[24].mxu1  ;;  %v1169_v31 = vsel %vm1137_vm11, %v1105_v22, %v1153_v24 }
 0x1f9   : > { %v2797_v28 = vpop.f32.mrb[25].mxu1 }
 0x1fa   : > { %v2798_v29 = vadd.f32 %v2797_v28, %v2796_v27  ;;  %v2799_v30 = vpop.f32.mrb[26].mxu1  ;;  %v1170_v32 = vsel %vm1138_vm12, %v1108_v25, %v1154_v26 }
 0x1fb   : > { %v2800_v33 = vpop.f32.mrb[27].mxu1  ;;  %v1180_v34 = vpack.c.bf16 %v1170_v32, %v1169_v31 }
 0x1fc   : > { %v1113_v35 = vadd.f32 %v2798_v29, %v3409_v11  ;;  %v2801_v38 = vadd.f32 %v2800_v33, %v2799_v30 }
 0x1fd   : > { %2946 = vmatmul.mubr.bf16.gmra.mrb[40].mxu0 %v1180_v34 }
 0x1fe   : > { %v1155_v42 = vmul.f32 0.01, %v1113_v35  ;;  %v1116_v43 = vadd.f32 %v2801_v38, %v3409_v11  ;;  %vm1139_vm13 = vcmp.gt.f32.partialorder %v1113_v35, 0.0 }
 0x200   : > { %vm1140_vm14 = vcmp.gt.f32.partialorder %v1116_v43, 0.0  ;;  %v1156_v44 = vmul.f32 0.01, %v1116_v43  ;;  %v2802_v45 = vpop.f32.mrb[28].mxu1  ;;  %v1171_v49 = vsel %vm1139_vm13, %v1113_v35, %v1155_v42 }
 0x201   : > { %v2803_v46 = vpop.f32.mrb[29].mxu1 }
 0x202   : > { %v2804_v47 = vadd.f32 %v2803_v46, %v2802_v45  ;;  %v2805_v48 = vpop.f32.mrb[30].mxu1  ;;  %v1172_v50 = vsel %vm1140_vm14, %v1116_v43, %v1156_v44 }
 0x203   : > { %v2806_v51 = vpop.f32.mrb[31].mxu1  ;;  %v1181_v52 = vpack.c.bf16 %v1172_v50, %v1171_v49 }
 0x204   : > { %v1121_v53 = vadd.f32 %v2804_v47, %v3409_v11  ;;  %v2807_v54 = vadd.f32 %v2806_v51, %v2805_v48 }
 0x205   : > { %2949 = vmatprep.mubr.bf16.mxu0 %v1181_v52 }
 0x206   : > { %v1157_v55 = vmul.f32 0.01, %v1121_v53  ;;  %v1124_v56 = vadd.f32 %v2807_v54, %v3409_v11  ;;  %vm1141_vm15 = vcmp.gt.f32.partialorder %v1121_v53, 0.0  ;;  %v1611_v11 = vsel %vm1609_vm1, %v1576_v62, 0 }
 0x208   : > { %vm1142_vm0 = vcmp.gt.f32.partialorder %v1124_v56, 0.0  ;;  %v1158_v57 = vmul.f32 0.01, %v1124_v56  ;;  %v1173_v58 = vsel %vm1141_vm15, %v1121_v53, %v1157_v55 }
 0x20a   : > { %v1174_v59 = vsel %vm1142_vm0, %v1124_v56, %v1158_v57 }
 0x20b   : > { %v1182_v60 = vpack.c.bf16 %v1174_v59, %v1173_v58 }
 0x20d   : > { %2950 = vmatmul.mubr.bf16.gmra.mrb[44].mxu0 %v1182_v60 }
 0x2b0   : > { %v2939_v0 = vpop.f32.mrb[32].mxu0 }
 0x2b1   : > { %v1297_v1 = vadd.f32 %v2939_v0, %v3438_v63  ;;  %v1288_v3 = vpop.f32.mrb[33].mxu0 }
 0x2b2   : > { %v1289_v4 = vadd.f32 %v3438_v63, %v1288_v3  ;;  %v2940_v5 = vpop.f32.mrb[34].mxu0 }
 0x2b3   : > { %v1369_v6 = vmul.f32 0.01, %v1297_v1  ;;  %v1300_v40 = vadd.f32 %v2940_v5, %v3438_v63  ;;  %v1291_v41 = vpop.f32.mrb[35].mxu0  ;;  %vm1353_vm2 = vcmp.gt.f32.partialorder %v1297_v1, 0.0 }
 0x2b4   : > { %v1367_v7 = vmul.f32 0.01, %v1289_v4  ;;  %v1292_v8 = vadd.f32 %v3438_v63, %v1291_v41  ;;  %vm1351_vm3 = vcmp.gt.f32.partialorder %v1289_v4, 0.0 }
 0x2b5   : > { %vm1354_vm4 = vcmp.gt.f32.partialorder %v1300_v40, 0.0  ;;  %v1370_v10 = vmul.f32 0.01, %v1300_v40  ;;  %v1385_v13 = vsel %vm1353_vm2, %v1297_v1, %v1369_v6 }
 0x2b6   : > { %vm1352_vm5 = vcmp.gt.f32.partialorder %v1292_v8, 0.0  ;;  %v1368_v12 = vmul.f32 0.01, %v1292_v8  ;;  %v1383_v14 = vsel %vm1351_vm3, %v1289_v4, %v1367_v7  ;;  %vm1584_vm3 = vcmask 64512  }
 0x2b7   : > { %v1386_v9 = vsel %vm1354_vm4, %v1300_v40, %v1370_v10 }
 0x2b8   : > { %v1400_v15 = vpack.c.bf16 %v1386_v9, %v1385_v13  ;;  %v1384_v16 = vsel %vm1352_vm5, %v1292_v8, %v1368_v12  ;;  %v3079_v9 = vld [vmem:[%s3741_s11] sm:$0xff]  }
 0x2b9   : > { %v1399_v17 = vpack.c.bf16 %v1384_v16, %v1383_v14  ;;  %2995 = vmatprep.subr.bf16.mxu1 %v3079_v9 }
 0x2bb   : > { %2961 = vmatprep.mubr.msk.bf16.mxu0 %vm1446_vm6, %v1399_v17 }
 0x2bc   : > { %2962 = vmatmul.mubr.msk.bf16.vlgmr.msra.gmra.mrb[48].mxu0 %vm1446_vm6, %v1400_v15  ;;  %v2674_v15 = vld [vmem:[%s3738_s8] ss:$0 sm:$0xff] }
 0x2bd   : > { %2978 = vmatpush3.bf16.msra.mxu0 %v1611_v11 }
 0x2c0   : > { %v2943_v18 = vpop.f32.mrb[36].mxu0 }
 0x2c1   : > { %v1313_v19 = vadd.f32 %v2943_v18, %v3438_v63  ;;  %v1304_v20 = vpop.f32.mrb[37].mxu0 }
 0x2c2   : > { %v1305_v21 = vadd.f32 %v3438_v63, %v1304_v20  ;;  %v2944_v22 = vpop.f32.mrb[38].mxu0 }
 0x2c3   : > { %v1373_v23 = vmul.f32 0.01, %v1313_v19  ;;  %v1316_v24 = vadd.f32 %v2944_v22, %v3438_v63  ;;  %v1307_v25 = vpop.f32.mrb[39].mxu0  ;;  %vm1357_vm7 = vcmp.gt.f32.partialorder %v1313_v19, 0.0 }
 0x2c4   : > { %v1371_v26 = vmul.f32 0.01, %v1305_v21  ;;  %v1308_v27 = vadd.f32 %v3438_v63, %v1307_v25  ;;  %vm1355_vm8 = vcmp.gt.f32.partialorder %v1305_v21, 0.0 }
 0x2c5   : > { %vm1358_vm9 = vcmp.gt.f32.partialorder %v1316_v24, 0.0  ;;  %v1374_v28 = vmul.f32 0.01, %v1316_v24  ;;  %v1389_v30 = vsel %vm1357_vm7, %v1313_v19, %v1373_v23 }
 0x2c6   : > { %vm1356_vm10 = vcmp.gt.f32.partialorder %v1308_v27, 0.0  ;;  %v1372_v29 = vmul.f32 0.01, %v1308_v27  ;;  %v1387_v32 = vsel %vm1355_vm8, %v1305_v21, %v1371_v26 }
 0x2c7   : > { %v1390_v31 = vsel %vm1358_vm9, %v1316_v24, %v1374_v28 }
 0x2c8   : > { %v1402_v33 = vpack.c.bf16 %v1390_v31, %v1389_v30  ;;  %v1388_v34 = vsel %vm1356_vm10, %v1308_v27, %v1372_v29 }
 0x2c9   : > { %v1401_v35 = vpack.c.bf16 %v1388_v34, %v1387_v32 }
 0x2cb   : > { %2965 = vmatprep.mubr.msk.bf16.mxu0 %vm1446_vm6, %v1401_v35 }
 0x2cc   : > { %2966 = vmatmul.mubr.msk.bf16.gmra.mrb[52].mxu0 %vm1446_vm6, %v1402_v33 }
 0x2d0   : > { %v2947_v38 = vpop.f32.mrb[40].mxu0 }
 0x2d1   : > { %v1329_v42 = vadd.f32 %v2947_v38, %v3438_v63  ;;  %v1320_v43 = vpop.f32.mrb[41].mxu0 }
 0x2d2   : > { %v1321_v44 = vadd.f32 %v3438_v63, %v1320_v43  ;;  %v2948_v45 = vpop.f32.mrb[42].mxu0 }
 0x2d3   : > { %v1377_v46 = vmul.f32 0.01, %v1329_v42  ;;  %v1332_v47 = vadd.f32 %v2948_v45, %v3438_v63  ;;  %v1323_v48 = vpop.f32.mrb[43].mxu0  ;;  %vm1361_vm11 = vcmp.gt.f32.partialorder %v1329_v42, 0.0 }
 0x2d4   : > { %v1375_v49 = vmul.f32 0.01, %v1321_v44  ;;  %v1324_v50 = vadd.f32 %v3438_v63, %v1323_v48  ;;  %vm1359_vm12 = vcmp.gt.f32.partialorder %v1321_v44, 0.0 }
 0x2d5   : > { %vm1362_vm13 = vcmp.gt.f32.partialorder %v1332_v47, 0.0  ;;  %v1378_v51 = vmul.f32 0.01, %v1332_v47  ;;  %v1393_v53 = vsel %vm1361_vm11, %v1329_v42, %v1377_v46 }
 0x2d6   : > { %vm1360_vm14 = vcmp.gt.f32.partialorder %v1324_v50, 0.0  ;;  %v1376_v52 = vmul.f32 0.01, %v1324_v50  ;;  %v1391_v55 = vsel %vm1359_vm12, %v1321_v44, %v1375_v49 }
 0x2d7   : > { %v1394_v54 = vsel %vm1362_vm13, %v1332_v47, %v1378_v51 }
 0x2d8   : > { %v1404_v56 = vpack.c.bf16 %v1394_v54, %v1393_v53  ;;  %v1392_v57 = vsel %vm1360_vm14, %v1324_v50, %v1376_v52 }
 0x2d9   : > { %v1403_v58 = vpack.c.bf16 %v1392_v57, %v1391_v55 }
 0x2db   : > { %2969 = vmatprep.mubr.msk.bf16.mxu1 %vm1446_vm6, %v1403_v58 }
 0x2dc   : > { %2970 = vmatmul.mubr.msk.bf16.vlgmr.msra.gmra.mrb[32].mxu1 %vm1446_vm6, %v1404_v56 }
 0x2dd   : > { %2996 = vmatpush3.bf16.msra.mxu1 %v3079_v9 }
 0x2e0   : > { %v2951_v59 = vpop.f32.mrb[44].mxu0 }
 0x2e1   : > { %v1345_v60 = vadd.f32 %v2951_v59, %v3438_v63  ;;  %v1336_v61 = vpop.f32.mrb[45].mxu0 }
 0x2e2   : > { %v1337_v62 = vadd.f32 %v3438_v63, %v1336_v61  ;;  %v2952_v11 = vpop.f32.mrb[46].mxu0  ;;  %v3082_v61 = vld [vmem:[%s3741_s11 + $0x18] sm:$0xff]  }
 0x2e3   : > { %v1381_v0 = vmul.f32 0.01, %v1345_v60  ;;  %v1348_v1 = vadd.f32 %v2952_v11, %v3438_v63  ;;  %v1339_v3 = vpop.f32.mrb[47].mxu0  ;;  %vm1365_vm15 = vcmp.gt.f32.partialorder %v1345_v60, 0.0  ;;  %v3085_v11 = vld [vmem:[%s3743_s13 + $0x4] ss:$8 sps:$4 sm:$0xff]  }
 0x2e4   : > { %v1379_v4 = vmul.f32 0.01, %v1337_v62  ;;  %v1340_v5 = vadd.f32 %v3438_v63, %v1339_v3  ;;  %vm1363_vm0 = vcmp.gt.f32.partialorder %v1337_v62, 0.0  ;;  %v3080_v63 = vld [vmem:[%s3741_s11 + $0x8] sm:$0xff]   ;;  %2090 = vmatprep.subr.bf16.mxu0 %v3085_v11 }
 0x2e5   : > { %vm1366_vm1 = vcmp.gt.f32.partialorder %v1348_v1, 0.0  ;;  %v1382_v6 = vmul.f32 0.01, %v1348_v1  ;;  %v1397_v41 = vsel %vm1365_vm15, %v1345_v60, %v1381_v0  ;;  %2997 = vmatprep.subr.bf16.mxu1 %v3080_v63  ;;  %v3081_v60 = vld [vmem:[%s3741_s11 + $0x10] sm:$0xff]   ;;  %v3091_v3 = vld [vmem:[%s3743_s13 + $0x24] ss:$8 sps:$4 sm:$0xff]  }
 0x2e6   : > { %vm1364_vm2 = vcmp.gt.f32.partialorder %v1340_v5, 0.0  ;;  %v1380_v40 = vmul.f32 0.01, %v1340_v5  ;;  %v1395_v8 = vsel %vm1363_vm0, %v1337_v62, %v1379_v4  ;;  %2998 = vmatpush3.bf16.msra.mxu1 %v3080_v63  ;;  %v3083_v62 = vld [vmem:[%s3743_s13] ss:$8 sps:$4 sm:$0xff]  }
 0x2e7   : > { %v1398_v7 = vsel %vm1366_vm1, %v1348_v1, %v1382_v6  ;;  %2999 = vmatprep.subr.bf16.mxu1 %v3081_v60  ;;  %v3088_v0 = vld [vmem:[%s3743_s13 + $0x14] ss:$8 sps:$4 sm:$0xff]   ;;  %v3086_v1 = vld [vmem:[%s3743_s13 + $0x10] ss:$8 sps:$4 sm:$0xff]   ;;  %v3089_v4 = vld [vmem:[%s3743_s13 + $0x20] ss:$8 sps:$4 sm:$0xff]  }
 0x2e8   : > { %v1406_v10 = vpack.c.bf16 %v1398_v7, %v1397_v41  ;;  %v1396_v12 = vsel %vm1364_vm2, %v1340_v5, %v1380_v40  ;;  %v3094_v5 = vld [vmem:[%s3743_s13 + $0x34] ss:$8 sps:$4 sm:$0xff]   ;;  %v3092_v6 = vld [vmem:[%s3743_s13 + $0x30] ss:$8 sps:$4 sm:$0xff]   ;;  %v3097_v40 = vld [vmem:[%s3743_s13 + $0x44] ss:$8 sps:$4 sm:$0xff]  }
 0x2e9   : > { %v1405_v13 = vpack.c.bf16 %v1396_v12, %v1395_v8  ;;  %v3095_v41 = vld [vmem:[%s3743_s13 + $0x40] ss:$8 sps:$4 sm:$0xff]   ;;  %v3100_v7 = vld [vmem:[%s3743_s13 + $0x54] ss:$8 sps:$4 sm:$0xff]   ;;  %v3098_v8 = vld [vmem:[%s3743_s13 + $0x50] ss:$8 sps:$4 sm:$0xff]  }
 0x2ea   : > { %3000 = vmatpush3.bf16.msra.mxu1 %v3081_v60 }
 0x2eb   : > { %2973 = vmatprep.mubr.msk.bf16.mxu1 %vm1446_vm6, %v1405_v13  ;;  %3001 = vmatprep.subr.bf16.mxu1 %v3082_v61 }
 0x2ec   : > { %2974 = vmatmul.mubr.msk.bf16.gmra.mrb[36].mxu1 %vm1446_vm6, %v1406_v10  ;;  %v3527_v10 = vld [vmem:[%s3740_s10] ss:$0 sm:$0xff] }
 0x2ee   : > { %3002 = vmatpush3.bf16.msra.mxu1 %v3082_v61 }
 0x38f   : > { %v2963_v14 = vpop.f32.mrb[48].mxu0 }
 0x390   : > { %v1505_v16 = vpop.f32.mrb[49].mxu0  ;;  %v1514_v18 = vadd.f32 %v2963_v14, %v2674_v15 }
 0x391   : > { %v2964_v17 = vpop.f32.mrb[50].mxu0  ;;  %v1506_v21 = vadd.f32 %v2674_v15, %v1505_v16 }
 0x392   : > { %v1517_v19 = vadd.f32 %v2964_v17, %v2674_v15  ;;  %v1508_v20 = vpop.f32.mrb[51].mxu0 }
 0x393   : > { %v1509_v22 = vadd.f32 %v2674_v15, %v1508_v20 }
 0x394   : > { %v1569_v23 = vpack.c.bf16 %v1517_v19, %v1514_v18 }
 0x395   : > { %v1568_v24 = vpack.c.bf16 %v1509_v22, %v1506_v21 }
 0x397   : > { %2979 = vmatprep.mubr.msk.bf16.mxu0 %vm1584_vm3, %v1568_v24 }
 0x398   : > { %2980 = vmatmul.mubr.msk.bf16.vlgmr.msra.gmra.mrb[56].mxu0 %vm1584_vm3, %v1569_v23 }
 0x399   : > { %2091 = vmatpush1.bf16.msra.mxu0 %v3083_v62 }
 0x39a   : > { %2092 = vmatprep.subr.bf16.mxu0 %v3088_v0 }
 0x39d   : > { %2093 = vmatpush1.bf16.msra.mxu0 %v3086_v1 }
 0x39e   : > { %2094 = vmatprep.subr.bf16.mxu0 %v3091_v3 }
 0x39f   : > { %v2967_v25 = vpop.f32.mrb[52].mxu0 }
 0x3a0   : > { %v1521_v26 = vpop.f32.mrb[53].mxu0  ;;  %v1530_v28 = vadd.f32 %v2967_v25, %v2674_v15 }
 0x3a1   : > { %v2968_v27 = vpop.f32.mrb[54].mxu0  ;;  %v1522_v31 = vadd.f32 %v2674_v15, %v1521_v26  ;;  %2095 = vmatpush1.bf16.msra.mxu0 %v3089_v4 }
 0x3a2   : > { %v1533_v29 = vadd.f32 %v2968_v27, %v2674_v15  ;;  %v1524_v30 = vpop.f32.mrb[55].mxu0  ;;  %2096 = vmatprep.subr.bf16.mxu0 %v3094_v5 }
 0x3a3   : > { %v1525_v32 = vadd.f32 %v2674_v15, %v1524_v30 }
 0x3a4   : > { %v1571_v33 = vpack.c.bf16 %v1533_v29, %v1530_v28 }
 0x3a5   : > { %v1570_v34 = vpack.c.bf16 %v1525_v32, %v1522_v31  ;;  %2097 = vmatpush1.bf16.msra.mxu0 %v3092_v6 }
 0x3a6   : > { %2098 = vmatprep.subr.bf16.mxu0 %v3097_v40 }
 0x3a7   : > { %2983 = vmatprep.mubr.msk.bf16.mxu0 %vm1584_vm3, %v1570_v34 }
 0x3a8   : > { %2984 = vmatmul.mubr.msk.bf16.gmra.mrb[60].mxu0 %vm1584_vm3, %v1571_v33 }
 0x3a9   : > { %2099 = vmatpush1.bf16.msra.mxu0 %v3095_v41 }
 0x3aa   : > { %2100 = vmatprep.subr.bf16.mxu0 %v3100_v7 }
 0x3ad   : > { %2101 = vmatpush1.bf16.msra.mxu0 %v3098_v8 }
 0x3af   : > { %v2971_v35 = vpop.f32.mrb[32].mxu1 }
 0x3b0   : > { %v1537_v38 = vpop.f32.mrb[33].mxu1  ;;  %v1546_v43 = vadd.f32 %v2971_v35, %v2674_v15 }
 0x3b1   : > { %v2972_v42 = vpop.f32.mrb[34].mxu1  ;;  %v1538_v46 = vadd.f32 %v2674_v15, %v1537_v38 }
 0x3b2   : > { %v1549_v44 = vadd.f32 %v2972_v42, %v2674_v15  ;;  %v1540_v45 = vpop.f32.mrb[35].mxu1 }
 0x3b3   : > { %v1541_v47 = vadd.f32 %v2674_v15, %v1540_v45 }
 0x3b4   : > { %v1573_v48 = vpack.c.bf16 %v1549_v44, %v1546_v43 }
 0x3b5   : > { %v1572_v49 = vpack.c.bf16 %v1541_v47, %v1538_v46 }
 0x3b7   : > { %2987 = vmatprep.mubr.msk.bf16.mxu0 %vm1584_vm3, %v1572_v49 }
 0x3b8   : > { %2988 = vmatmul.mubr.msk.bf16.gmra.mrb[64].mxu0 %vm1584_vm3, %v1573_v48 }
 0x3bf   : > { %v2975_v50 = vpop.f32.mrb[36].mxu1 }
 0x3c0   : > { %v1553_v51 = vpop.f32.mrb[37].mxu1  ;;  %v1562_v53 = vadd.f32 %v2975_v50, %v2674_v15 }
 0x3c1   : > { %v2976_v52 = vpop.f32.mrb[38].mxu1  ;;  %v1554_v56 = vadd.f32 %v2674_v15, %v1553_v51 }
 0x3c2   : > { %v1565_v54 = vadd.f32 %v2976_v52, %v2674_v15  ;;  %v1556_v55 = vpop.f32.mrb[39].mxu1 }
 0x3c3   : > { %v1557_v57 = vadd.f32 %v2674_v15, %v1556_v55 }
 0x3c4   : > { %v1575_v58 = vpack.c.bf16 %v1565_v54, %v1562_v53 }
 0x3c5   : > { %v1574_v59 = vpack.c.bf16 %v1557_v57, %v1554_v56 }
 0x3c7   : > { %2991 = vmatprep.mubr.msk.bf16.mxu0 %vm1584_vm3, %v1574_v59 }
 0x3c8   : > { %2992 = vmatmul.mubr.msk.bf16.gmra.mrb[68].mxu0 %vm1584_vm3, %v1575_v58 }
 0x3c9   : > { %2122 = vmatprep.mubr.bf16.mxu0 %v3131_v2 }
 0x46b   : > { %v2981_v12 = vpop.f32.mrb[56].mxu0 }
 0x46c   : > { %v1656_v13 = vadd.f32 %v2981_v12, %v3527_v10  ;;  %v1647_v9 = vpop.f32.mrb[57].mxu0 }
 0x46d   : > { %v1648_v63 = vadd.f32 %v3527_v10, %v1647_v9  ;;  %v2982_v14 = vpop.f32.mrb[58].mxu0 }
 0x46e   : > { %v1728_v15 = vmul.f32 0.01, %v1656_v13  ;;  %v1659_v16 = vadd.f32 %v2982_v14, %v3527_v10  ;;  %v1650_v17 = vpop.f32.mrb[59].mxu0  ;;  %vm1712_vm4 = vcmp.gt.f32.partialorder %v1656_v13, 0.0 }
 0x46f   : > { %v1726_v18 = vmul.f32 0.01, %v1648_v63  ;;  %v1651_v19 = vadd.f32 %v3527_v10, %v1650_v17  ;;  %vm1710_vm5 = vcmp.gt.f32.partialorder %v1648_v63, 0.0 }
 0x470   : > { %vm1713_vm7 = vcmp.gt.f32.partialorder %v1659_v16, 0.0  ;;  %v1729_v20 = vmul.f32 0.01, %v1659_v16  ;;  %v1744_v22 = vsel %vm1712_vm4, %v1656_v13, %v1728_v15 }
 0x471   : > { %vm1711_vm8 = vcmp.gt.f32.partialorder %v1651_v19, 0.0  ;;  %v1727_v21 = vmul.f32 0.01, %v1651_v19  ;;  %v1742_v24 = vsel %vm1710_vm5, %v1648_v63, %v1726_v18 }
 0x472   : > { %v1745_v23 = vsel %vm1713_vm7, %v1659_v16, %v1729_v20 }
 0x473   : > { %v1759_v25 = vpack.c.bf16 %v1745_v23, %v1744_v22  ;;  %v1743_v26 = vsel %vm1711_vm8, %v1651_v19, %v1727_v21  ;;  %v3103_v23 = vld [vmem:[%s3743_s13 + $0x64] ss:$8 sps:$4 sm:$0xff]  }
 0x474   : > { %v1758_v27 = vpack.c.bf16 %v1743_v26, %v1742_v24  ;;  %2102 = vmatprep.subr.bf16.mxu0 %v3103_v23  ;;  %v3106_v24 = vld [vmem:[%s3743_s13 + $0x74] ss:$8 sps:$4 sm:$0xff]   ;;  %v3107_v26 = vld [vmem:[%s3745_s15 + $0x40] sm:$0xff]  }
 0x475   : > { %2857 = vmatprep.subr.bf16.mxu1 %v3107_v26 }
 0x476   : > { %3003 = vmatprep.mubr.msk.bf16.mxu1 %vm1446_vm6, %v1758_v27  ;;  %v3108_v27 = vld [vmem:[%s3745_s15] sm:$0xff]  }
 0x477   : > { %3004 = vmatmul.mubr.msk.bf16.vlgmr.msra.gmra.mrb[40].mxu1 %vm1446_vm6, %v1759_v25  ;;  %v3104_v25 = vld [vmem:[%s3743_s13 + $0x70] ss:$8 sps:$4 sm:$0xff]  }
 0x478   : > { %2858 = vmatpush3.bf16.msra.mxu1 %v3108_v27 }
 0x47b   : > { %v2985_v28 = vpop.f32.mrb[60].mxu0 }
 0x47c   : > { %v1672_v29 = vadd.f32 %v2985_v28, %v3527_v10  ;;  %v1663_v30 = vpop.f32.mrb[61].mxu0  ;;  %v3109_v28 = vld [vmem:[%s3745_s15 + $0x48] sm:$0xff]  }
 0x47d   : > { %v1664_v31 = vadd.f32 %v3527_v10, %v1663_v30  ;;  %v2986_v32 = vpop.f32.mrb[62].mxu0  ;;  %2859 = vmatprep.subr.bf16.mxu1 %v3109_v28  ;;  %v3111_v30 = vld [vmem:[%s3745_s15 + $0x50] sm:$0xff]  }
 0x47e   : > { %v1732_v33 = vmul.f32 0.01, %v1672_v29  ;;  %v1675_v34 = vadd.f32 %v2986_v32, %v3527_v10  ;;  %v1666_v35 = vpop.f32.mrb[63].mxu0  ;;  %vm1716_vm9 = vcmp.gt.f32.partialorder %v1672_v29, 0.0  ;;  %v3113_v32 = vld [vmem:[%s3745_s15 + $0x58] sm:$0xff]  }
 0x47f   : > { %v1730_v38 = vmul.f32 0.01, %v1664_v31  ;;  %v1667_v42 = vadd.f32 %v3527_v10, %v1666_v35  ;;  %vm1714_vm10 = vcmp.gt.f32.partialorder %v1664_v31, 0.0  ;;  %v3116_v35 = vld [vmem:[%s3745_s15 + $0x20] sm:$0xff]  }
 0x480   : > { %vm1717_vm11 = vcmp.gt.f32.partialorder %v1675_v34, 0.0  ;;  %v1733_v43 = vmul.f32 0.01, %v1675_v34  ;;  %v1748_v45 = vsel %vm1716_vm9, %v1672_v29, %v1732_v33  ;;  %v3110_v29 = vld [vmem:[%s3745_s15 + $0x8] sm:$0xff]   ;;  %v3114_v33 = vld [vmem:[%s3745_s15 + $0x18] sm:$0xff]  }
 0x481   : > { %vm1715_vm12 = vcmp.gt.f32.partialorder %v1667_v42, 0.0  ;;  %v1731_v44 = vmul.f32 0.01, %v1667_v42  ;;  %v1746_v47 = vsel %vm1714_vm10, %v1664_v31, %v1730_v38  ;;  %2860 = vmatpush3.bf16.msra.mxu1 %v3110_v29  ;;  %v3112_v31 = vld [vmem:[%s3745_s15 + $0x10] sm:$0xff]   ;;  %v3117_v38 = vld [vmem:[%s3745_s15 + $0x68] sm:$0xff]  }
 0x482   : > { %v1749_v46 = vsel %vm1717_vm11, %v1675_v34, %v1733_v43  ;;  %2861 = vmatprep.subr.bf16.mxu1 %v3111_v30  ;;  %v3115_v34 = vld [vmem:[%s3745_s15 + $0x60] sm:$0xff]  }
 0x483   : > { %v1761_v48 = vpack.c.bf16 %v1749_v46, %v1748_v45  ;;  %v1747_v49 = vsel %vm1715_vm12, %v1667_v42, %v1731_v44  ;;  %v3601_v42 = vld [vmem:[%s3742_s12] ss:$0 sm:$0xff] }
 0x484   : > { %v1760_v50 = vpack.c.bf16 %v1747_v49, %v1746_v47 }
 0x485   : > { %2862 = vmatpush3.bf16.msra.mxu1 %v3112_v31 }
 0x486   : > { %3007 = vmatprep.mubr.msk.bf16.mxu1 %vm1446_vm6, %v1760_v50  ;;  %2863 = vmatprep.subr.bf16.mxu1 %v3113_v32 }
 0x487   : > { %3008 = vmatmul.mubr.msk.bf16.gmra.mrb[44].mxu1 %vm1446_vm6, %v1761_v48 }
 0x489   : > { %2864 = vmatpush3.bf16.msra.mxu1 %v3114_v33 }
 0x48a   : > { %2865 = vmatprep.subr.bf16.mxu1 %v3115_v34 }
 0x48b   : > { %v2989_v51 = vpop.f32.mrb[64].mxu0 }
 0x48c   : > { %v1688_v52 = vadd.f32 %v2989_v51, %v3527_v10  ;;  %v1679_v53 = vpop.f32.mrb[65].mxu0 }
 0x48d   : > { %v1680_v54 = vadd.f32 %v3527_v10, %v1679_v53  ;;  %v2990_v55 = vpop.f32.mrb[66].mxu0  ;;  %2866 = vmatpush3.bf16.msra.mxu1 %v3116_v35 }
 0x48e   : > { %v1736_v56 = vmul.f32 0.01, %v1688_v52  ;;  %v1691_v57 = vadd.f32 %v2990_v55, %v3527_v10  ;;  %v1682_v58 = vpop.f32.mrb[67].mxu0  ;;  %vm1720_vm13 = vcmp.gt.f32.partialorder %v1688_v52, 0.0  ;;  %2867 = vmatprep.subr.bf16.mxu1 %v3117_v38 }
 0x48f   : > { %v1734_v59 = vmul.f32 0.01, %v1680_v54  ;;  %v1683_v60 = vadd.f32 %v3527_v10, %v1682_v58  ;;  %vm1718_vm14 = vcmp.gt.f32.partialorder %v1680_v54, 0.0 }
 0x490   : > { %vm1721_vm15 = vcmp.gt.f32.partialorder %v1691_v57, 0.0  ;;  %v1737_v61 = vmul.f32 0.01, %v1691_v57  ;;  %v1752_v11 = vsel %vm1720_vm13, %v1688_v52, %v1736_v56 }
 0x491   : > { %vm1719_vm0 = vcmp.gt.f32.partialorder %v1683_v60, 0.0  ;;  %v1735_v62 = vmul.f32 0.01, %v1683_v60  ;;  %v1750_v1 = vsel %vm1718_vm14, %v1680_v54, %v1734_v59 }
 0x492   : > { %v1753_v0 = vsel %vm1721_vm15, %v1691_v57, %v1737_v61 }
 0x493   : > { %v1763_v3 = vpack.c.bf16 %v1753_v0, %v1752_v11  ;;  %v1751_v4 = vsel %vm1719_vm0, %v1683_v60, %v1735_v62 }
 0x494   : > { %v1762_v5 = vpack.c.bf16 %v1751_v4, %v1750_v1 }
 0x496   : > { %3011 = vmatprep.mubr.msk.bf16.mxu1 %vm1446_vm6, %v1762_v5 }
 0x497   : > { %3012 = vmatmul.mubr.msk.bf16.gmra.mrb[48].mxu1 %vm1446_vm6, %v1763_v3 }
 0x49b   : > { %v2993_v6 = vpop.f32.mrb[68].mxu0 }
 0x49c   : > { %v1704_v40 = vadd.f32 %v2993_v6, %v3527_v10  ;;  %v1695_v41 = vpop.f32.mrb[69].mxu0 }
 0x49d   : > { %v1696_v7 = vadd.f32 %v3527_v10, %v1695_v41  ;;  %v2994_v8 = vpop.f32.mrb[70].mxu0 }
 0x49e   : > { %v1740_v12 = vmul.f32 0.01, %v1704_v40  ;;  %v1707_v13 = vadd.f32 %v2994_v8, %v3527_v10  ;;  %v1698_v9 = vpop.f32.mrb[71].mxu0  ;;  %vm1724_vm1 = vcmp.gt.f32.partialorder %v1704_v40, 0.0 }
 0x49f   : > { %v1738_v63 = vmul.f32 0.01, %v1696_v7  ;;  %v1699_v14 = vadd.f32 %v3527_v10, %v1698_v9  ;;  %vm1722_vm2 = vcmp.gt.f32.partialorder %v1696_v7, 0.0  ;;  %v3101_v10 = vld [vmem:[%s3743_s13 + $0x60] ss:$8 sps:$4 sm:$0xff]  }
 0x4a0   : > { %vm1725_vm3 = vcmp.gt.f32.partialorder %v1707_v13, 0.0  ;;  %v1741_v15 = vmul.f32 0.01, %v1707_v13  ;;  %v1756_v17 = vsel %vm1724_vm1, %v1704_v40, %v1740_v12  ;;  %2103 = vmatpush1.bf16.msra.mxu0 %v3101_v10 }
 0x4a1   : > { %vm1723_vm4 = vcmp.gt.f32.partialorder %v1699_v14, 0.0  ;;  %v1739_v16 = vmul.f32 0.01, %v1699_v14  ;;  %v1754_v19 = vsel %vm1722_vm2, %v1696_v7, %v1738_v63  ;;  %2104 = vmatprep.subr.bf16.mxu0 %v3106_v24 }
 0x4a2   : > { %v1757_v18 = vsel %vm1725_vm3, %v1707_v13, %v1741_v15 }
 0x4a3   : > { %v1765_v20 = vpack.c.bf16 %v1757_v18, %v1756_v17  ;;  %v1755_v21 = vsel %vm1723_vm4, %v1699_v14, %v1739_v16 }
 0x4a4   : > { %v1764_v22 = vpack.c.bf16 %v1755_v21, %v1754_v19  ;;  %2105 = vmatpush1.bf16.msra.mxu0 %v3104_v25 }
 0x4a6   : > { %3015 = vmatprep.mubr.msk.bf16.mxu1 %vm1446_vm6, %v1764_v22 }
 0x4a7   : > { %3016 = vmatmul.mubr.msk.bf16.gmra.mrb[52].mxu1 %vm1446_vm6, %v1765_v20 }
 0x54a   : > { %v3005_v43 = vpop.f32.mrb[40].mxu1 }
 0x54b   : > { %v1872_v44 = vadd.f32 %v3005_v43, %v3601_v42  ;;  %v1863_v45 = vpop.f32.mrb[41].mxu1 }
 0x54c   : > { %v1864_v46 = vadd.f32 %v3601_v42, %v1863_v45  ;;  %v3006_v47 = vpop.f32.mrb[42].mxu1 }
 0x54d   : > { %v1944_v48 = vmul.f32 0.01, %v1872_v44  ;;  %v1875_v49 = vadd.f32 %v3006_v47, %v3601_v42  ;;  %v1866_v50 = vpop.f32.mrb[43].mxu1  ;;  %vm1928_vm6 = vcmp.gt.f32.partialorder %v1872_v44, 0.0 }
 0x54e   : > { %v1942_v51 = vmul.f32 0.01, %v1864_v46  ;;  %v1867_v52 = vadd.f32 %v3601_v42, %v1866_v50  ;;  %vm1926_vm5 = vcmp.gt.f32.partialorder %v1864_v46, 0.0 }
 0x54f   : > { %vm1929_vm7 = vcmp.gt.f32.partialorder %v1875_v49, 0.0  ;;  %v1945_v53 = vmul.f32 0.01, %v1875_v49  ;;  %v1960_v55 = vsel %vm1928_vm6, %v1872_v44, %v1944_v48 }
 0x550   : > { %vm1927_vm8 = vcmp.gt.f32.partialorder %v1867_v52, 0.0  ;;  %v1943_v54 = vmul.f32 0.01, %v1867_v52  ;;  %v1958_v57 = vsel %vm1926_vm5, %v1864_v46, %v1942_v51 }
 0x551   : > { %v1961_v56 = vsel %vm1929_vm7, %v1875_v49, %v1945_v53 }
 0x552   : > { %v1959_v58 = vsel %vm1927_vm8, %v1867_v52, %v1943_v54  ;;  %v1975_v59 = vpack.c.bf16 %v1961_v56, %v1960_v55  ;;  %v3119_v56 = vld [vmem:[%s3745_s15 + $0x70] sm:$0xff]  }
 0x553   : > { %v1974_v60 = vpack.c.bf16 %v1959_v58, %v1958_v57  ;;  %v3120_v57 = vld [vmem:[%s3745_s15 + $0x30] sm:$0xff]   ;;  %v3122_v58 = vld [vmem:[%s3745_s15 + $0x38] sm:$0xff]  }
 0x555   : > { %2123 = vmatmul.mubr.bf16.vlgmr.msra.gmra.mrb[72].mxu0 %v1974_v60 }
 0x556   : > { %2132 = vmatprep.mubr.bf16.mxu0 %v3131_v2 }
 0x55a   : > { %v3009_v61 = vpop.f32.mrb[44].mxu1 }
 0x55b   : > { %v1888_v62 = vadd.f32 %v3009_v61, %v3601_v42  ;;  %v1879_v11 = vpop.f32.mrb[45].mxu1 }
 0x55c   : > { %v1880_v0 = vadd.f32 %v3601_v42, %v1879_v11  ;;  %v3010_v1 = vpop.f32.mrb[46].mxu1 }
 0x55d   : > { %v1948_v3 = vmul.f32 0.01, %v1888_v62  ;;  %v1891_v4 = vadd.f32 %v3010_v1, %v3601_v42  ;;  %v1882_v5 = vpop.f32.mrb[47].mxu1  ;;  %2133 = vmatmul.mubr.bf16.gmra.mrb[76].mxu0 %v1975_v59  ;;  %vm1932_vm9 = vcmp.gt.f32.partialorder %v1888_v62, 0.0  ;;  %v1998_v59 = vld [vmem:[%s3744_s14] sm:$0x3] }
 0x55e   : > { %v1946_v6 = vmul.f32 0.01, %v1880_v0  ;;  %v1883_v40 = vadd.f32 %v3601_v42, %v1882_v5  ;;  %2142 = vmatprep.mubr.bf16.mxu0 %v3131_v2  ;;  %vm1930_vm10 = vcmp.gt.f32.partialorder %v1880_v0, 0.0  ;;  %v3646_v60 = vrot.slane %v1998_v59, %v577_v37 }
 0x55f   : > { %vm1933_vm11 = vcmp.gt.f32.partialorder %v1891_v4, 0.0  ;;  %v1949_v41 = vmul.f32 0.01, %v1891_v4  ;;  %v1964_v8 = vsel %vm1932_vm9, %v1888_v62, %v1948_v3  ;;  %v3650_v61 = vrot.slane %v1998_v59, %v581_v39 }
 0x560   : > { %vm1931_vm12 = vcmp.gt.f32.partialorder %v1883_v40, 0.0  ;;  %v1947_v7 = vmul.f32 0.01, %v1883_v40  ;;  %v1962_v13 = vsel %vm1930_vm10, %v1880_v0, %v1946_v6 }
 0x561   : > { %v1965_v12 = vsel %vm1933_vm11, %v1891_v4, %v1949_v41 }
 0x562   : > { %v1963_v9 = vsel %vm1931_vm12, %v1883_v40, %v1947_v7  ;;  %v1977_v63 = vpack.c.bf16 %v1965_v12, %v1964_v8 }
 0x563   : > { %v1976_v14 = vpack.c.bf16 %v1963_v9, %v1962_v13 }
 0x565   : > { %2143 = vmatmul.mubr.bf16.gmra.mrb[80].mxu0 %v1976_v14 }
 0x566   : > { %2152 = vmatprep.mubr.bf16.mxu0 %v3131_v2 }
 0x56a   : > { %v3013_v15 = vpop.f32.mrb[48].mxu1 }
 0x56b   : > { %v1904_v16 = vadd.f32 %v3013_v15, %v3601_v42  ;;  %v1895_v17 = vpop.f32.mrb[49].mxu1 }
 0x56c   : > { %v1896_v18 = vadd.f32 %v3601_v42, %v1895_v17  ;;  %v3014_v19 = vpop.f32.mrb[50].mxu1 }
 0x56d   : > { %v1952_v20 = vmul.f32 0.01, %v1904_v16  ;;  %v1907_v21 = vadd.f32 %v3014_v19, %v3601_v42  ;;  %v1898_v22 = vpop.f32.mrb[51].mxu1  ;;  %2153 = vmatmul.mubr.bf16.gmra.mrb[84].mxu0 %v1977_v63  ;;  %vm1936_vm13 = vcmp.gt.f32.partialorder %v1904_v16, 0.0 }
 0x56e   : > { %v1950_v23 = vmul.f32 0.01, %v1896_v18  ;;  %v1899_v10 = vadd.f32 %v3601_v42, %v1898_v22  ;;  %2162 = vmatprep.mubr.bf16.mxu0 %v3131_v2  ;;  %vm1934_vm14 = vcmp.gt.f32.partialorder %v1896_v18, 0.0 }
 0x56f   : > { %vm1937_vm15 = vcmp.gt.f32.partialorder %v1907_v21, 0.0  ;;  %v1953_v24 = vmul.f32 0.01, %v1907_v21  ;;  %v1968_v26 = vsel %vm1936_vm13, %v1904_v16, %v1952_v20 }
 0x570   : > { %vm1935_vm0 = vcmp.gt.f32.partialorder %v1899_v10, 0.0  ;;  %v1951_v25 = vmul.f32 0.01, %v1899_v10  ;;  %v1966_v28 = vsel %vm1934_vm14, %v1896_v18, %v1950_v23 }
 0x571   : > { %v1969_v27 = vsel %vm1937_vm15, %v1907_v21, %v1953_v24 }
 0x572   : > { %v1967_v29 = vsel %vm1935_vm0, %v1899_v10, %v1951_v25  ;;  %v1979_v30 = vpack.c.bf16 %v1969_v27, %v1968_v26 }
 0x573   : > { %v1978_v31 = vpack.c.bf16 %v1967_v29, %v1966_v28 }
 0x575   : > { %2163 = vmatmul.mubr.bf16.gmra.mrb[88].mxu0 %v1978_v31 }
 0x576   : > { %2172 = vmatprep.mubr.bf16.mxu0 %v3131_v2 }
 0x57a   : > { %v3017_v32 = vpop.f32.mrb[52].mxu1 }
 0x57b   : > { %v1920_v33 = vadd.f32 %v3017_v32, %v3601_v42  ;;  %v1911_v34 = vpop.f32.mrb[53].mxu1 }
 0x57c   : > { %v1912_v35 = vadd.f32 %v3601_v42, %v1911_v34  ;;  %v3018_v38 = vpop.f32.mrb[54].mxu1 }
 0x57d   : > { %v1956_v43 = vmul.f32 0.01, %v1920_v33  ;;  %v1923_v44 = vadd.f32 %v3018_v38, %v3601_v42  ;;  %v1914_v45 = vpop.f32.mrb[55].mxu1  ;;  %2173 = vmatmul.mubr.bf16.gmra.mrb[92].mxu0 %v1979_v30  ;;  %vm1940_vm1 = vcmp.gt.f32.partialorder %v1920_v33, 0.0 }
 0x57e   : > { %v1954_v46 = vmul.f32 0.01, %v1912_v35  ;;  %v1915_v47 = vadd.f32 %v3601_v42, %v1914_v45  ;;  %2182 = vmatprep.mubr.bf16.mxu0 %v3131_v2  ;;  %vm1938_vm2 = vcmp.gt.f32.partialorder %v1912_v35, 0.0  ;;  %v3118_v42 = vld [vmem:[%s3745_s15 + $0x28] sm:$0xff]  }
 0x57f   : > { %vm1941_vm3 = vcmp.gt.f32.partialorder %v1923_v44, 0.0  ;;  %v1957_v48 = vmul.f32 0.01, %v1923_v44  ;;  %v1972_v50 = vsel %vm1940_vm1, %v1920_v33, %v1956_v43  ;;  %2868 = vmatpush3.bf16.msra.mxu1 %v3118_v42 }
 0x580   : > { %vm1939_vm4 = vcmp.gt.f32.partialorder %v1915_v47, 0.0  ;;  %v1955_v49 = vmul.f32 0.01, %v1915_v47  ;;  %v1970_v52 = vsel %vm1938_vm2, %v1912_v35, %v1954_v46  ;;  %2869 = vmatprep.subr.bf16.mxu1 %v3119_v56 }
 0x581   : > { %v1973_v51 = vsel %vm1941_vm3, %v1923_v44, %v1957_v48 }
 0x582   : > { %v1971_v53 = vsel %vm1939_vm4, %v1915_v47, %v1955_v49  ;;  %v1981_v54 = vpack.c.bf16 %v1973_v51, %v1972_v50 }
 0x583   : > { %v1980_v55 = vpack.c.bf16 %v1971_v53, %v1970_v52  ;;  %2870 = vmatpush3.bf16.msra.mxu1 %v3120_v57 }
 0x585   : > { %2183 = vmatmul.mubr.bf16.gmra.mrb[96].mxu0 %v1980_v55 }
 0x586   : > { %2192 = vmatprep.mubr.bf16.mxu0 %v3131_v2  ;;  %v3121_v2 = vld [vmem:[%s3745_s15 + $0x78] sm:$0xff]  }
 0x587   : > { %2871 = vmatprep.subr.bf16.mxu1 %v3121_v2 }
 0x588   : > { %2872 = vmatpush3.bf16.msra.mxu1 %v3122_v58 }
 0x58d   : > { %2193 = vmatmul.mubr.bf16.gmra.mrb[100].mxu0 %v1981_v54 }
 0x628   : > { %v2124_v62 = vpop.f32.mrb[72].mxu0 }
 0x629   : > { %v2125_v11 = vadd.f32 %v2124_v62, %v3646_v60  ;;  %v2126_v0 = vpop.f32.mrb[73].mxu0 }
 0x62a   : > { %v2127_v1 = vadd.f32 %v2126_v0, %v3650_v61  ;;  %v2128_v3 = vpop.f32.mrb[74].mxu0 }
 0x62b   : > { %v2235_v4 = vmul.f32 0.01, %v2125_v11  ;;  %v2129_v5 = vadd.f32 %v2128_v3, %v3646_v60  ;;  %v2130_v6 = vpop.f32.mrb[75].mxu0  ;;  %vm2203_vm6 = vcmp.gt.f32.partialorder %v2125_v11, 0.0 }
 0x62c   : > { %v2236_v40 = vmul.f32 0.01, %v2127_v1  ;;  %v2131_v37 = vadd.f32 %v2130_v6, %v3650_v61  ;;  %vm2204_vm5 = vcmp.gt.f32.partialorder %v2127_v1, 0.0 }
 0x62d   : > { %vm2205_vm7 = vcmp.gt.f32.partialorder %v2129_v5, 0.0  ;;  %v2237_v36 = vmul.f32 0.01, %v2129_v5  ;;  %v2267_v41 = vsel %vm2203_vm6, %v2125_v11, %v2235_v4 }
 0x62e   : > { %vm2206_vm8 = vcmp.gt.f32.partialorder %v2131_v37, 0.0  ;;  %v2238_v39 = vmul.f32 0.01, %v2131_v37  ;;  %v2268_v13 = vsel %vm2204_vm5, %v2127_v1, %v2236_v40 }
 0x62f   : > { %v2269_v7 = vsel %vm2205_vm7, %v2129_v5, %v2237_v36 }
 0x630   : > { %v2299_v8 = vpack.c.bf16 %v2269_v7, %v2267_v41  ;;  %v2134_v12 = vpop.f32.mrb[76].mxu0  ;;  %v2270_v9 = vsel %vm2206_vm8, %v2131_v37, %v2238_v39 }
 0x631   : > { %v2135_v63 = vadd.f32 %v2134_v12, %v3646_v60  ;;  %v2136_v14 = vpop.f32.mrb[77].mxu0  ;;  %v2300_v15 = vpack.c.bf16 %v2270_v9, %v2268_v13 }
 0x632   : > { %v2137_v16 = vadd.f32 %v2136_v14, %v3650_v61  ;;  %v2138_v17 = vpop.f32.mrb[78].mxu0 }
 0x633   : > { %v2239_v18 = vmul.f32 0.01, %v2135_v63  ;;  %v2139_v19 = vadd.f32 %v2138_v17, %v3646_v60  ;;  %v2140_v20 = vpop.f32.mrb[79].mxu0  ;;  %2482 = vmatprep.mubr.bf16.mxu1 %v2300_v15  ;;  %vm2207_vm9 = vcmp.gt.f32.partialorder %v2135_v63, 0.0 }
 0x634   : > { %v2240_v21 = vmul.f32 0.01, %v2137_v16  ;;  %v2141_v22 = vadd.f32 %v2140_v20, %v3650_v61  ;;  %2483 = vmatmul.mubr.bf16.vlgmr.msra.gmra.mrb[56].mxu1 %v2299_v8  ;;  %vm2208_vm10 = vcmp.gt.f32.partialorder %v2137_v16, 0.0 }
 0x635   : > { %vm2209_vm11 = vcmp.gt.f32.partialorder %v2139_v19, 0.0  ;;  %v2241_v23 = vmul.f32 0.01, %v2139_v19  ;;  %v2271_v24 = vsel %vm2207_vm9, %v2135_v63, %v2239_v18 }
 0x636   : > { %vm2210_vm12 = vcmp.gt.f32.partialorder %v2141_v22, 0.0  ;;  %v2242_v10 = vmul.f32 0.01, %v2141_v22  ;;  %v2272_v27 = vsel %vm2208_vm10, %v2137_v16, %v2240_v21 }
 0x637   : > { %v2273_v25 = vsel %vm2209_vm11, %v2139_v19, %v2241_v23 }
 0x638   : > { %v2144_v26 = vpop.f32.mrb[80].mxu0  ;;  %v2274_v28 = vsel %vm2210_vm12, %v2141_v22, %v2242_v10  ;;  %v2301_v29 = vpack.c.bf16 %v2273_v25, %v2271_v24 }
 0x639   : > { %v2145_v30 = vadd.f32 %v2144_v26, %v3646_v60  ;;  %v2146_v31 = vpop.f32.mrb[81].mxu0  ;;  %v2302_v32 = vpack.c.bf16 %v2274_v28, %v2272_v27 }
 0x63a   : > { %v2147_v33 = vadd.f32 %v2146_v31, %v3650_v61  ;;  %v2148_v34 = vpop.f32.mrb[82].mxu0 }
 0x63b   : > { %v2243_v35 = vmul.f32 0.01, %v2145_v30  ;;  %v2149_v38 = vadd.f32 %v2148_v34, %v3646_v60  ;;  %v2150_v43 = vpop.f32.mrb[83].mxu0  ;;  %2490 = vmatprep.mubr.bf16.mxu1 %v2302_v32  ;;  %vm2211_vm13 = vcmp.gt.f32.partialorder %v2145_v30, 0.0 }
 0x63c   : > { %v2244_v44 = vmul.f32 0.01, %v2147_v33  ;;  %v2151_v45 = vadd.f32 %v2150_v43, %v3650_v61  ;;  %2491 = vmatmul.mubr.bf16.gmra.mrb[60].mxu1 %v2301_v29  ;;  %vm2212_vm14 = vcmp.gt.f32.partialorder %v2147_v33, 0.0 }
 0x63d   : > { %vm2213_vm15 = vcmp.gt.f32.partialorder %v2149_v38, 0.0  ;;  %v2245_v46 = vmul.f32 0.01, %v2149_v38  ;;  %v2275_v48 = vsel %vm2211_vm13, %v2145_v30, %v2243_v35 }
 0x63e   : > { %vm2214_vm0 = vcmp.gt.f32.partialorder %v2151_v45, 0.0  ;;  %v2246_v47 = vmul.f32 0.01, %v2151_v45  ;;  %v2276_v51 = vsel %vm2212_vm14, %v2147_v33, %v2244_v44 }
 0x63f   : > { %v2277_v49 = vsel %vm2213_vm15, %v2149_v38, %v2245_v46 }
 0x640   : > { %v2154_v50 = vpop.f32.mrb[84].mxu0  ;;  %v2278_v52 = vsel %vm2214_vm0, %v2151_v45, %v2246_v47  ;;  %v2303_v53 = vpack.c.bf16 %v2277_v49, %v2275_v48 }
 0x641   : > { %v2155_v54 = vadd.f32 %v2154_v50, %v3646_v60  ;;  %v2156_v55 = vpop.f32.mrb[85].mxu0  ;;  %v2304_v42 = vpack.c.bf16 %v2278_v52, %v2276_v51 }
 0x642   : > { %v2157_v56 = vadd.f32 %v2156_v55, %v3650_v61  ;;  %v2158_v57 = vpop.f32.mrb[86].mxu0 }
 0x643   : > { %v2247_v2 = vmul.f32 0.01, %v2155_v54  ;;  %v2159_v58 = vadd.f32 %v2158_v57, %v3646_v60  ;;  %v2160_v59 = vpop.f32.mrb[87].mxu0  ;;  %2498 = vmatprep.mubr.bf16.mxu1 %v2304_v42  ;;  %vm2215_vm1 = vcmp.gt.f32.partialorder %v2155_v54, 0.0 }
 0x644   : > { %v2248_v62 = vmul.f32 0.01, %v2157_v56  ;;  %v2161_v11 = vadd.f32 %v2160_v59, %v3650_v61  ;;  %2499 = vmatmul.mubr.bf16.gmra.mrb[64].mxu1 %v2303_v53  ;;  %vm2216_vm2 = vcmp.gt.f32.partialorder %v2157_v56, 0.0 }
 0x645   : > { %vm2217_vm3 = vcmp.gt.f32.partialorder %v2159_v58, 0.0  ;;  %v2249_v0 = vmul.f32 0.01, %v2159_v58  ;;  %v2279_v3 = vsel %vm2215_vm1, %v2155_v54, %v2247_v2 }
 0x646   : > { %vm2218_vm4 = vcmp.gt.f32.partialorder %v2161_v11, 0.0  ;;  %v2250_v1 = vmul.f32 0.01, %v2161_v11  ;;  %v2280_v6 = vsel %vm2216_vm2, %v2157_v56, %v2248_v62 }
 0x647   : > { %v2281_v4 = vsel %vm2217_vm3, %v2159_v58, %v2249_v0 }
 0x648   : > { %v2164_v5 = vpop.f32.mrb[88].mxu0  ;;  %v2282_v40 = vsel %vm2218_vm4, %v2161_v11, %v2250_v1  ;;  %v2305_v37 = vpack.c.bf16 %v2281_v4, %v2279_v3 }
 0x649   : > { %v2165_v36 = vadd.f32 %v2164_v5, %v3646_v60  ;;  %v2166_v39 = vpop.f32.mrb[89].mxu0  ;;  %v2306_v41 = vpack.c.bf16 %v2282_v40, %v2280_v6 }
 0x64a   : > { %v2167_v7 = vadd.f32 %v2166_v39, %v3650_v61  ;;  %v2168_v8 = vpop.f32.mrb[90].mxu0 }
 0x64b   : > { %v2251_v12 = vmul.f32 0.01, %v2165_v36  ;;  %v2169_v13 = vadd.f32 %v2168_v8, %v3646_v60  ;;  %v2170_v9 = vpop.f32.mrb[91].mxu0  ;;  %2506 = vmatprep.mubr.bf16.mxu1 %v2306_v41  ;;  %vm2219_vm6 = vcmp.gt.f32.partialorder %v2165_v36, 0.0 }
 0x64c   : > { %v2252_v63 = vmul.f32 0.01, %v2167_v7  ;;  %v2171_v14 = vadd.f32 %v2170_v9, %v3650_v61  ;;  %2507 = vmatmul.mubr.bf16.gmra.mrb[68].mxu1 %v2305_v37  ;;  %vm2220_vm5 = vcmp.gt.f32.partialorder %v2167_v7, 0.0 }
 0x64d   : > { %vm2221_vm7 = vcmp.gt.f32.partialorder %v2169_v13, 0.0  ;;  %v2253_v15 = vmul.f32 0.01, %v2169_v13  ;;  %v2283_v17 = vsel %vm2219_vm6, %v2165_v36, %v2251_v12 }
 0x64e   : > { %vm2222_vm8 = vcmp.gt.f32.partialorder %v2171_v14, 0.0  ;;  %v2254_v16 = vmul.f32 0.01, %v2171_v14  ;;  %v2284_v20 = vsel %vm2220_vm5, %v2167_v7, %v2252_v63 }
 0x64f   : > { %v2285_v18 = vsel %vm2221_vm7, %v2169_v13, %v2253_v15 }
 0x650   : > { %v2174_v19 = vpop.f32.mrb[92].mxu0  ;;  %v2286_v21 = vsel %vm2222_vm8, %v2171_v14, %v2254_v16  ;;  %v2307_v22 = vpack.c.bf16 %v2285_v18, %v2283_v17 }
 0x651   : > { %v2175_v23 = vadd.f32 %v2174_v19, %v3646_v60  ;;  %v2176_v10 = vpop.f32.mrb[93].mxu0  ;;  %v2308_v24 = vpack.c.bf16 %v2286_v21, %v2284_v20 }
 0x652   : > { %v2177_v25 = vadd.f32 %v2176_v10, %v3650_v61  ;;  %v2178_v26 = vpop.f32.mrb[94].mxu0 }
 0x653   : > { %v2255_v27 = vmul.f32 0.01, %v2175_v23  ;;  %v2179_v28 = vadd.f32 %v2178_v26, %v3646_v60  ;;  %v2180_v29 = vpop.f32.mrb[95].mxu0  ;;  %2514 = vmatprep.mubr.bf16.mxu1 %v2308_v24  ;;  %vm2223_vm9 = vcmp.gt.f32.partialorder %v2175_v23, 0.0 }
 0x654   : > { %v2256_v30 = vmul.f32 0.01, %v2177_v25  ;;  %v2181_v31 = vadd.f32 %v2180_v29, %v3650_v61  ;;  %2515 = vmatmul.mubr.bf16.gmra.mrb[72].mxu1 %v2307_v22  ;;  %vm2224_vm10 = vcmp.gt.f32.partialorder %v2177_v25, 0.0 }
 0x655   : > { %vm2225_vm11 = vcmp.gt.f32.partialorder %v2179_v28, 0.0  ;;  %v2257_v32 = vmul.f32 0.01, %v2179_v28  ;;  %v2287_v34 = vsel %vm2223_vm9, %v2175_v23, %v2255_v27 }
 0x656   : > { %vm2226_vm12 = vcmp.gt.f32.partialorder %v2181_v31, 0.0  ;;  %v2258_v33 = vmul.f32 0.01, %v2181_v31  ;;  %v2288_v43 = vsel %vm2224_vm10, %v2177_v25, %v2256_v30 }
 0x657   : > { %v2289_v35 = vsel %vm2225_vm11, %v2179_v28, %v2257_v32 }
 0x658   : > { %v2184_v38 = vpop.f32.mrb[96].mxu0  ;;  %v2290_v44 = vsel %vm2226_vm12, %v2181_v31, %v2258_v33  ;;  %v2309_v45 = vpack.c.bf16 %v2289_v35, %v2287_v34 }
 0x659   : > { %v2185_v46 = vadd.f32 %v2184_v38, %v3646_v60  ;;  %v2186_v47 = vpop.f32.mrb[97].mxu0  ;;  %v2310_v48 = vpack.c.bf16 %v2290_v44, %v2288_v43 }
 0x65a   : > { %v2187_v49 = vadd.f32 %v2186_v47, %v3650_v61  ;;  %v2188_v50 = vpop.f32.mrb[98].mxu0 }
 0x65b   : > { %v2259_v51 = vmul.f32 0.01, %v2185_v46  ;;  %v2189_v52 = vadd.f32 %v2188_v50, %v3646_v60  ;;  %v2190_v53 = vpop.f32.mrb[99].mxu0  ;;  %2522 = vmatprep.mubr.bf16.mxu1 %v2310_v48  ;;  %vm2227_vm13 = vcmp.gt.f32.partialorder %v2185_v46, 0.0 }
 0x65c   : > { %v2260_v54 = vmul.f32 0.01, %v2187_v49  ;;  %v2191_v55 = vadd.f32 %v2190_v53, %v3650_v61  ;;  %2523 = vmatmul.mubr.bf16.gmra.mrb[76].mxu1 %v2309_v45  ;;  %vm2228_vm14 = vcmp.gt.f32.partialorder %v2187_v49, 0.0 }
 0x65d   : > { %vm2229_vm15 = vcmp.gt.f32.partialorder %v2189_v52, 0.0  ;;  %v2261_v42 = vmul.f32 0.01, %v2189_v52  ;;  %v2291_v57 = vsel %vm2227_vm13, %v2185_v46, %v2259_v51 }
 0x65e   : > { %vm2230_vm0 = vcmp.gt.f32.partialorder %v2191_v55, 0.0  ;;  %v2262_v56 = vmul.f32 0.01, %v2191_v55  ;;  %v2292_v59 = vsel %vm2228_vm14, %v2187_v49, %v2260_v54 }
 0x65f   : > { %v2293_v2 = vsel %vm2229_vm15, %v2189_v52, %v2261_v42 }
 0x660   : > { %v2194_v58 = vpop.f32.mrb[100].mxu0  ;;  %v2294_v62 = vsel %vm2230_vm0, %v2191_v55, %v2262_v56  ;;  %v2311_v11 = vpack.c.bf16 %v2293_v2, %v2291_v57 }
 0x661   : > { %v2195_v0 = vadd.f32 %v2194_v58, %v3646_v60  ;;  %v2196_v1 = vpop.f32.mrb[101].mxu0  ;;  %v2312_v3 = vpack.c.bf16 %v2294_v62, %v2292_v59 }
 0x662   : > { %v2197_v4 = vadd.f32 %v2196_v1, %v3650_v61  ;;  %v2198_v5 = vpop.f32.mrb[102].mxu0 }
 0x663   : > { %v2263_v6 = vmul.f32 0.01, %v2195_v0  ;;  %v2199_v40 = vadd.f32 %v2198_v5, %v3646_v60  ;;  %v2200_v37 = vpop.f32.mrb[103].mxu0  ;;  %2530 = vmatprep.mubr.bf16.mxu1 %v2312_v3  ;;  %vm2231_vm1 = vcmp.gt.f32.partialorder %v2195_v0, 0.0 }
 0x664   : > { %v2264_v36 = vmul.f32 0.01, %v2197_v4  ;;  %v2201_v39 = vadd.f32 %v2200_v37, %v3650_v61  ;;  %2531 = vmatmul.mubr.bf16.gmra.mrb[80].mxu1 %v2311_v11  ;;  %vm2232_vm2 = vcmp.gt.f32.partialorder %v2197_v4, 0.0  ;;  %v3688_v61 = vld [vmem:[%s3746_s16] ss:$0 sm:$0xff] }
 0x665   : > { %vm2233_vm3 = vcmp.gt.f32.partialorder %v2199_v40, 0.0  ;;  %v2265_v41 = vmul.f32 0.01, %v2199_v40  ;;  %v2295_v8 = vsel %vm2231_vm1, %v2195_v0, %v2263_v6 }
 0x666   : > { %vm2234_vm4 = vcmp.gt.f32.partialorder %v2201_v39, 0.0  ;;  %v2266_v7 = vmul.f32 0.01, %v2201_v39  ;;  %v2296_v13 = vsel %vm2232_vm2, %v2197_v4, %v2264_v36 }
 0x667   : > { %v2297_v12 = vsel %vm2233_vm3, %v2199_v40, %v2265_v41 }
 0x668   : > { %v2298_v9 = vsel %vm2234_vm4, %v2201_v39, %v2266_v7  ;;  %v2313_v63 = vpack.c.bf16 %v2297_v12, %v2295_v8 }
 0x669   : > { %v2314_v14 = vpack.c.bf16 %v2298_v9, %v2296_v13 }
 0x66b   : > { %2538 = vmatprep.mubr.bf16.mxu1 %v2314_v14 }
 0x66c   : > { %2539 = vmatmul.mubr.bf16.gmra.mrb[84].mxu1 %v2313_v63 }
 0x707   : > { %v2873_v60 = vpop.f32.mrb[56].mxu1 }
 0x708   : > { %v2874_v15 = vpop.f32.mrb[57].mxu1 }
 0x709   : > { %v2875_v16 = vadd.f32 %v2874_v15, %v2873_v60  ;;  %v2876_v17 = vpop.f32.mrb[58].mxu1 }
 0x70a   : > { %v2877_v18 = vpop.f32.mrb[59].mxu1 }
 0x70b   : > { %v2485_v19 = vadd.f32 %v2875_v16, %v3688_v61  ;;  %v2878_v20 = vadd.f32 %v2877_v18, %v2876_v17 }
 0x70d   : > { %2547 = vst [vmem:[%s3693_s20] sm:$0xff] %v2485_v19  ;;  %v2488_v21 = vadd.f32 %v2878_v20, %v3688_v61 }
 0x70f   : > { %2548 = vst [vmem:[%s3693_s20 + $0x8] sm:$0xff] %v2488_v21  ;;  %v2879_v22 = vpop.f32.mrb[60].mxu1 }
 0x710   : > { %v2880_v23 = vpop.f32.mrb[61].mxu1 }
 0x711   : > { %v2881_v10 = vadd.f32 %v2880_v23, %v2879_v22  ;;  %v2882_v24 = vpop.f32.mrb[62].mxu1 }
 0x712   : > { %v2883_v25 = vpop.f32.mrb[63].mxu1 }
 0x713   : > { %v2493_v26 = vadd.f32 %v2881_v10, %v3688_v61  ;;  %v2884_v27 = vadd.f32 %v2883_v25, %v2882_v24 }
 0x715   : > { %2549 = vst [vmem:[%s3693_s20 + $0x10] sm:$0xff] %v2493_v26  ;;  %v2496_v28 = vadd.f32 %v2884_v27, %v3688_v61 }
 0x717   : > { %2550 = vst [vmem:[%s3693_s20 + $0x18] sm:$0xff] %v2496_v28  ;;  %v2885_v29 = vpop.f32.mrb[64].mxu1 }
 0x718   : > { %v2886_v30 = vpop.f32.mrb[65].mxu1 }
 0x719   : > { %v2887_v31 = vadd.f32 %v2886_v30, %v2885_v29  ;;  %v2888_v32 = vpop.f32.mrb[66].mxu1 }
 0x71a   : > { %v2889_v33 = vpop.f32.mrb[67].mxu1 }
 0x71b   : > { %v2501_v34 = vadd.f32 %v2887_v31, %v3688_v61  ;;  %v2890_v35 = vadd.f32 %v2889_v33, %v2888_v32 }
 0x71d   : > { %2551 = vst [vmem:[%s3693_s20 + $0x20] sm:$0xff] %v2501_v34  ;;  %v2504_v38 = vadd.f32 %v2890_v35, %v3688_v61 }
 0x71f   : > { %2552 = vst [vmem:[%s3693_s20 + $0x28] sm:$0xff] %v2504_v38  ;;  %v2891_v43 = vpop.f32.mrb[68].mxu1 }
 0x720   : > { %v2892_v44 = vpop.f32.mrb[69].mxu1 }
 0x721   : > { %v2893_v45 = vadd.f32 %v2892_v44, %v2891_v43  ;;  %v2894_v46 = vpop.f32.mrb[70].mxu1 }
 0x722   : > { %v2895_v47 = vpop.f32.mrb[71].mxu1 }
 0x723   : > { %v2509_v48 = vadd.f32 %v2893_v45, %v3688_v61  ;;  %v2896_v49 = vadd.f32 %v2895_v47, %v2894_v46 }
 0x725   : > { %2553 = vst [vmem:[%s3693_s20 + $0x30] sm:$0xff] %v2509_v48  ;;  %v2512_v50 = vadd.f32 %v2896_v49, %v3688_v61 }
 0x727   : > { %2554 = vst [vmem:[%s3693_s20 + $0x38] sm:$0xff] %v2512_v50  ;;  %v2897_v51 = vpop.f32.mrb[72].mxu1 }
 0x728   : > { %v2898_v52 = vpop.f32.mrb[73].mxu1 }
 0x729   : > { %v2899_v53 = vadd.f32 %v2898_v52, %v2897_v51  ;;  %v2900_v54 = vpop.f32.mrb[74].mxu1 }
 0x72a   : > { %v2901_v55 = vpop.f32.mrb[75].mxu1 }
 0x72b   : > { %v2517_v42 = vadd.f32 %v2899_v53, %v3688_v61  ;;  %v2902_v56 = vadd.f32 %v2901_v55, %v2900_v54 }
 0x72d   : > { %2555 = vst [vmem:[%s3693_s20 + $0x40] sm:$0xff] %v2517_v42  ;;  %v2520_v57 = vadd.f32 %v2902_v56, %v3688_v61 }
 0x72f   : > { %2556 = vst [vmem:[%s3693_s20 + $0x48] sm:$0xff] %v2520_v57  ;;  %v2903_v2 = vpop.f32.mrb[76].mxu1 }
 0x730   : > { %v2904_v58 = vpop.f32.mrb[77].mxu1 }
 0x731   : > { %v2905_v59 = vadd.f32 %v2904_v58, %v2903_v2  ;;  %v2906_v62 = vpop.f32.mrb[78].mxu1 }
 0x732   : > { %v2907_v11 = vpop.f32.mrb[79].mxu1 }
 0x733   : > { %v2525_v0 = vadd.f32 %v2905_v59, %v3688_v61  ;;  %v2908_v1 = vadd.f32 %v2907_v11, %v2906_v62 }
 0x735   : > { %2557 = vst [vmem:[%s3693_s20 + $0x50] sm:$0xff] %v2525_v0  ;;  %v2528_v3 = vadd.f32 %v2908_v1, %v3688_v61 }
 0x737   : > { %2558 = vst [vmem:[%s3693_s20 + $0x58] sm:$0xff] %v2528_v3  ;;  %v2909_v4 = vpop.f32.mrb[80].mxu1 }
 0x738   : > { %v2910_v5 = vpop.f32.mrb[81].mxu1 }
 0x739   : > { %v2911_v6 = vadd.f32 %v2910_v5, %v2909_v4  ;;  %v2912_v40 = vpop.f32.mrb[82].mxu1 }
 0x73a   : > { %v2913_v37 = vpop.f32.mrb[83].mxu1 }
 0x73b   : > { %v2533_v36 = vadd.f32 %v2911_v6, %v3688_v61  ;;  %v2914_v39 = vadd.f32 %v2913_v37, %v2912_v40 }
 0x73d   : > { %2559 = vst [vmem:[%s3693_s20 + $0x60] sm:$0xff] %v2533_v36  ;;  %v2536_v41 = vadd.f32 %v2914_v39, %v3688_v61 }
 0x73f   : > { %2560 = vst [vmem:[%s3693_s20 + $0x68] sm:$0xff] %v2536_v41  ;;  %v2915_v7 = vpop.f32.mrb[84].mxu1 }
 0x740   : > { %v2916_v8 = vpop.f32.mrb[85].mxu1 }
 0x741   : > { %v2917_v12 = vadd.f32 %v2916_v8, %v2915_v7  ;;  %v2918_v13 = vpop.f32.mrb[86].mxu1 }
 0x742   : > { %v2919_v9 = vpop.f32.mrb[87].mxu1 }
 0x743   : > { %v2541_v63 = vadd.f32 %v2917_v12, %v3688_v61  ;;  %v2920_v14 = vadd.f32 %v2919_v9, %v2918_v13 }
 0x745   : > { %2561 = vst [vmem:[%s3693_s20 + $0x70] sm:$0xff] %v2541_v63  ;;  %v2544_v60 = vadd.f32 %v2920_v14, %v3688_v61 }
 0x747   : > { %2562 = vst [vmem:[%s3693_s20 + $0x78] sm:$0xff] %v2544_v60 }
 0x748 PF: > { %s27_s24 = sadd.s32 1, %s3129_s24  }
 0x749   : > { %p24_p4 = scmp.ge.s32.totalorder %s27_s24, 4  }
 0x74b   :  { %26 = sbr.rel (!%p24_p4) target bundleno = 3 (0x3), region = 118 }

</bundles_post_ra>
